<compile_context>
chip_gen: v5e
topology: v5e:2x2
jax: 0.10.0
libtpu: 0.0.40
codegen_flags: <defaults>
</compile_context>

<pallas_src>
import jax
import jax.numpy as jnp
import numpy as np
from jax.experimental import pallas as pl
from jax.experimental.pallas import tpu as pltpu

# ---- hyper-parameters (mirror AttentionNetwork.__init__ / PerceiverI.__init__) ----
NUM_QUERIES = 4
NUM_HEADS = 4
DIM_HEAD = 16
QUERY_DIM = NUM_HEADS * DIM_HEAD            # 64
VAR_FLAT_DIM = NUM_QUERIES * QUERY_DIM      # 256
NUM_SCORES = NUM_QUERIES * NUM_HEADS        # 16 compact score lanes

OBS_DIM_FIXED = 8
VARIABLE_FEATURE_DIM = 6
SEQ_LEN = 8
OBS_DIM_VARIABLE = SEQ_LEN * VARIABLE_FEATURE_DIM   # 48
CRITIQUE_DIM = 4
NET_ARCH = (32, 32)                          # pi == vf arch, activation = Tanh
LN_EPS = 1e-5
NEG_MASK = -1e30                             # finite mask -> no NaN for all-masked rows


def _round_up(x, m):
    return (x + m - 1) // m * m


# ----------------------------------------------------------------------------- #
# Fused forward kernel: one grid step = TB batch rows.
# ----------------------------------------------------------------------------- #
def fused_forward_kernel(fc_ref, var_ref,
                         kvw_ref, kvb_ref,
                         wka_ref, bka_ref, wvt_ref, bvt_ref, ex_ref,
                         wo_ref, bo_ref,
                         w1fc_ref, w1a_ref, b1_ref, w2_ref, b2_ref,
                         out_ref):
    TB = fc_ref.shape[0]

    x3 = var_ref[...]                                            # [TB, S, F]
    xf = x3.reshape(TB * SEQ_LEN, VARIABLE_FEATURE_DIM)          # [TB*S, F] (layout no-op)

    # masks (PyTorch: valid = abs(sum over s,f) != 0 ; pad key = abs(sum over f) == 0)
    tok = jnp.sum(x3, axis=-1, keepdims=True)                    # [TB, S, 1]
    pad = jnp.abs(tok) == 0.0                                    # [TB, S, 1]
    valid = jnp.abs(jnp.sum(tok, axis=1)) != 0.0                 # [TB, 1]

    # kv_layers = Linear(F -> D) + LayerNorm(D).  LN gamma/beta are folded into
    # the downstream projections, so only the normalization itself runs here.
    kv = jnp.dot(xf, kvw_ref[...], preferred_element_type=jnp.float32) + kvb_ref[...]
    mu = jnp.mean(kv, axis=-1, keepdims=True)
    cen = kv - mu
    var_ = jnp.mean(cen * cen, axis=-1, keepdims=True)
    n = cen * jax.lax.rsqrt(var_ + LN_EPS)                       # [TB*S, D]

    # compact attention scores: one lane per (query, head).  Query latents, Wq,
    # Wk, the 1/sqrt(dh) scale and LN affine are all pre-folded into wka / bka.
    s = jnp.dot(n, wka_ref[...], preferred_element_type=jnp.float32) + bka_ref[...]   # [TB*S, 16]
    s3 = s.reshape(TB, SEQ_LEN, NUM_SCORES)
    s3 = jnp.where(pad, NEG_MASK, s3)

    # softmax over the key axis (axis=1); finite masking keeps everything NaN-free
    m = jnp.max(s3, axis=1, keepdims=True)                       # [TB, 1, 16]
    p = jnp.exp(s3 - m)                                          # [TB, S, 16]
    denom = jnp.sum(p, axis=1, keepdims=True)                    # [TB, 1, 16]
    pn = p * pl.reciprocal(denom, approx=True)                   # normalized probs

    # expand probs to the query-tiled 256-lane layout with one tiny 0/1 matmul
    pe = jnp.dot(pn.reshape(TB * SEQ_LEN, NUM_SCORES), ex_ref[...],
                 preferred_element_type=jnp.float32)             # [TB*S, 256]

    # query-tiled value projection (LN affine folded in) + weighted sum over keys
    vt = jnp.dot(n, wvt_ref[...], preferred_element_type=jnp.float32) + bvt_ref[...]  # [TB*S, 256]
    ctx = jnp.sum((pe * vt).reshape(TB, SEQ_LEN, VAR_FLAT_DIM), axis=1)               # [TB, 256]

    # MHA output projection with block-diagonal kron(I_Q, Wo)
    attn = jnp.dot(ctx, wo_ref[...], preferred_element_type=jnp.float32) + bo_ref[...]
    # rows whose whole variable block is zero stay zero (torch zeros scatter-back)
    attn = jnp.where(valid, attn, 0.0)

    # fused policy/value MLP heads: columns [:H] = pi, [H:] = vf
    h1 = jnp.tanh(jnp.dot(fc_ref[...], w1fc_ref[...], preferred_element_type=jnp.float32)
                  + jnp.dot(attn, w1a_ref[...], preferred_element_type=jnp.float32)
                  + b1_ref[...])
    out_ref[...] = jnp.tanh(jnp.dot(h1, w2_ref[...], preferred_element_type=jnp.float32)
                            + b2_ref[...])


# ----------------------------------------------------------------------------- #
# Derived (fused) weights built once per forward in plain JAX — all tiny.
# ----------------------------------------------------------------------------- #
def _fused_weights(p):
    f32 = jnp.float32
    scale = 1.0 / (DIM_HEAD ** 0.5)
    qvec = jnp.dot(p["latents"], p["wq"]) + p["bq"]                      # [Q, D]

    heads = jnp.arange(QUERY_DIM) // DIM_HEAD                            # head(d)
    c_q = jnp.arange(NUM_SCORES) // NUM_HEADS                            # query of score lane
    c_h = jnp.arange(NUM_SCORES) % NUM_HEADS                             # head of score lane
    # A_c[d, c] = scale * qvec[q(c), d] * [head(d) == h(c)]   -> compact score map
    a_c = scale * qvec[c_q].T * (heads[:, None] == c_h[None, :]).astype(f32)   # [D, 16]

    # fold LayerNorm affine (gamma, beta) + key projection into the score weights
    g_col = p["ln_g"].reshape(QUERY_DIM, 1)
    b_row = p["ln_b"]
    wka = jnp.dot(g_col * p["wk"], a_c)                                  # [D, 16]
    bka = jnp.dot(jnp.dot(b_row, p["wk"]) + p["bk"], a_c)                # [1, 16]
    wvt = jnp.tile(g_col * p["wv"], (1, NUM_QUERIES))                    # [D, Q*D]
    bvt = jnp.tile(jnp.dot(b_row, p["wv"]) + p["bv"], (1, NUM_QUERIES))  # [1, Q*D]

    # expansion matrix: score lane (q,h) -> all 16 value lanes of head h in query block q
    col = jnp.arange(VAR_FLAT_DIM)
    col_q = col // QUERY_DIM
    col_h = (col % QUERY_DIM) // DIM_HEAD
    ex = ((c_q[:, None] == col_q[None, :]) &
          (c_h[:, None] == col_h[None, :])).astype(f32)                  # [16, Q*D]

    wo_big = jnp.kron(jnp.eye(NUM_QUERIES, dtype=f32), p["wo"])          # [Q*D, Q*D]
    bo_big = jnp.tile(p["bo"], (1, NUM_QUERIES))                         # [1, Q*D]

    H1, H2 = NET_ARCH
    # first MLP layer split by input stream: [fixed(8) | crit(4)] and attn(256);
    # output columns are [pi | vf]; crit rows are zero on the pi side.
    w1fc = jnp.concatenate([
        jnp.concatenate([p["pi_w1"][:OBS_DIM_FIXED],
                         jnp.zeros((CRITIQUE_DIM, H1), f32)], axis=0),
        jnp.concatenate([p["vf_w1"][:OBS_DIM_FIXED],
                         p["vf_w1"][OBS_DIM_FIXED + VAR_FLAT_DIM:]], axis=0)], axis=1)  # [12, 2*H1]
    w1a = jnp.concatenate([p["pi_w1"][OBS_DIM_FIXED:],
                           p["vf_w1"][OBS_DIM_FIXED:OBS_DIM_FIXED + VAR_FLAT_DIM]],
                          axis=1)                                        # [256, 2*H1]
    b1 = jnp.concatenate([p["pi_b1"], p["vf_b1"]], axis=1)               # [1, 2*H1]
    w2 = jnp.zeros((2 * H1, 2 * H2), f32)
    w2 = w2.at[:H1, :H2].set(p["pi_w2"]).at[H1:, H2:].set(p["vf_w2"])    # block-diag
    b2 = jnp.concatenate([p["pi_b2"], p["vf_b2"]], axis=1)               # [1, 2*H2]

    return [p["kv_w"], p["kv_b"], wka, bka, wvt, bvt, ex,
            wo_big, bo_big, w1fc, w1a, b1, w2, b2]


# ----------------------------------------------------------------------------- #
# Parameter init (deterministic, synthetic) and full forward pass.
# ----------------------------------------------------------------------------- #
def init_params(key):
    ks = jax.random.split(key, 12)

    def lin(k, fan_in, fan_out):
        kw, kb = jax.random.split(k)
        bound = 1.0 / (fan_in ** 0.5)
        w = jax.random.uniform(kw, (fan_in, fan_out), jnp.float32, -bound, bound)
        b = jax.random.uniform(kb, (1, fan_out), jnp.float32, -bound, bound)
        return w, b

    p = {}
    p["latents"] = jax.random.normal(ks[0], (NUM_QUERIES, QUERY_DIM), jnp.float32)
    p["kv_w"], p["kv_b"] = lin(ks[1], VARIABLE_FEATURE_DIM, QUERY_DIM)
    # non-trivial LN affine so the weight-folding path is actually exercised
    p["ln_g"] = 1.0 + 0.1 * jax.random.normal(ks[10], (1, QUERY_DIM), jnp.float32)
    p["ln_b"] = 0.1 * jax.random.normal(ks[11], (1, QUERY_DIM), jnp.float32)
    p["wq"], p["bq"] = lin(ks[2], QUERY_DIM, QUERY_DIM)
    p["wk"], p["bk"] = lin(ks[3], QUERY_DIM, QUERY_DIM)
    p["wv"], p["bv"] = lin(ks[4], QUERY_DIM, QUERY_DIM)
    p["wo"], p["bo"] = lin(ks[5], QUERY_DIM, QUERY_DIM)
    in_pi = OBS_DIM_FIXED + VAR_FLAT_DIM
    in_vf = in_pi + CRITIQUE_DIM
    p["pi_w1"], p["pi_b1"] = lin(ks[6], in_pi, NET_ARCH[0])
    p["pi_w2"], p["pi_b2"] = lin(ks[7], NET_ARCH[0], NET_ARCH[1])
    p["vf_w1"], p["vf_b1"] = lin(ks[8], in_vf, NET_ARCH[0])
    p["vf_w2"], p["vf_b2"] = lin(ks[9], NET_ARCH[0], NET_ARCH[1])
    return p


@jax.jit
def attention_network_forward(features, params):
    """Returns (latent_policy, latent_value), mirroring AttentionNetwork.forward."""
    B = features.shape[0]
    fixed = features[:, :OBS_DIM_FIXED]
    var = features[:, OBS_DIM_FIXED:OBS_DIM_FIXED + OBS_DIM_VARIABLE].reshape(
        B, SEQ_LEN, VARIABLE_FEATURE_DIM)
    crit = features[:, OBS_DIM_FIXED + OBS_DIM_VARIABLE:]
    fc = jnp.concatenate([fixed, crit], axis=1)                  # [B, 12]

    weights = _fused_weights(params)

    # batch tiling: TB rows per grid step, batch axis parallel across cores
    TB = min(128, _round_up(B, 8))
    B_pad = _round_up(B, TB)
    if B_pad != B:
        padn = B_pad - B
        fc = jnp.pad(fc, ((0, padn), (0, 0)))
        var = jnp.pad(var, ((0, padn), (0, 0), (0, 0)))

    def data_spec(shape):
        nd = len(shape)
        return pl.BlockSpec((TB,) + tuple(shape[1:]),
                            lambda i, _nd=nd: (i,) + (0,) * (_nd - 1))

    def rep_spec(w):  # whole-array block, resident across the batch grid
        return pl.BlockSpec(w.shape, lambda i, _nd=w.ndim: (0,) * _nd)

    in_specs = [data_spec(fc.shape), data_spec(var.shape)] + [rep_spec(w) for w in weights]
    out_dim = 2 * NET_ARCH[1]
    out_specs = pl.BlockSpec((TB, out_dim), lambda i: (i, 0))

    out = pl.pallas_call(
        fused_forward_kernel,
        grid=(B_pad // TB,),
        in_specs=in_specs,
        out_specs=out_specs,
        out_shape=jax.ShapeDtypeStruct((B_pad, out_dim), jnp.float32),
        compiler_params=pltpu.CompilerParams(dimension_semantics=("parallel",)),
    )(fc, var, *weights)

    out = out[:B]
    return out[:, :NET_ARCH[1]], out[:, NET_ARCH[1]:]


# ----------------------------------------------------------------------------- #
# Pure-JAX reference (mirrors the PyTorch module) for a correctness self-check.
# ----------------------------------------------------------------------------- #
def reference_forward(features, p):
    B = features.shape[0]
    fixed = features[:, :OBS_DIM_FIXED]
    var = features[:, OBS_DIM_FIXED:OBS_DIM_FIXED + OBS_DIM_VARIABLE].reshape(
        B, SEQ_LEN, VARIABLE_FEATURE_DIM)
    crit = features[:, -CRITIQUE_DIM:]

    tok_sum = var.sum(-1)                                   # [B, S]
    valid = jnp.abs(tok_sum.sum(-1)) != 0                   # [B]
    pad = jnp.abs(tok_sum) == 0                             # [B, S]

    kv = var.reshape(B * SEQ_LEN, -1) @ p["kv_w"] + p["kv_b"]
    mu = kv.mean(-1, keepdims=True)
    va = ((kv - mu) ** 2).mean(-1, keepdims=True)
    kv = (kv - mu) / jnp.sqrt(va + LN_EPS) * p["ln_g"] + p["ln_b"]
    kv = kv.reshape(B, SEQ_LEN, QUERY_DIM)

    q = p["latents"] @ p["wq"] + p["bq"]                    # [Q, D]
    k = kv @ p["wk"] + p["bk"]                              # [B, S, D]
    v = kv @ p["wv"] + p["bv"]                              # [B, S, D]
    qh = q.reshape(NUM_QUERIES, NUM_HEADS, DIM_HEAD)
    kh = k.reshape(B, SEQ_LEN, NUM_HEADS, DIM_HEAD)
    vh = v.reshape(B, SEQ_LEN, NUM_HEADS, DIM_HEAD)
    sc = jnp.einsum('qhd,bshd->bhqs', qh, kh) / jnp.sqrt(DIM_HEAD).astype(jnp.float32)
    sc = jnp.where(pad[:, None, None, :], -jnp.inf, sc)
    att = jax.nn.softmax(sc, axis=-1)
    ctx = jnp.einsum('bhqs,bshd->bqhd', att, vh).reshape(B, NUM_QUERIES, QUERY_DIM)
    attn = ctx @ p["wo"] + p["bo"]                          # [B, Q, D]
    attn_flat = attn.reshape(B, VAR_FLAT_DIM)
    attn_flat = jnp.where(valid[:, None], attn_flat, 0.0)

    agent = jnp.concatenate([fixed, attn_flat], axis=1)
    critf = jnp.concatenate([agent, crit], axis=1)
    pi = jnp.tanh(jnp.tanh(agent @ p["pi_w1"] + p["pi_b1"]) @ p["pi_w2"] + p["pi_b2"])
    vf = jnp.tanh(jnp.tanh(critf @ p["vf_w1"] + p["vf_b1"]) @ p["vf_w2"] + p["vf_b2"])
    return pi, vf


if __name__ == "__main__":
    key = jax.random.PRNGKey(0)
    pkey, xkey = jax.random.split(key)
    params = init_params(pkey)

    B = 2
    total_dim = OBS_DIM_FIXED + OBS_DIM_VARIABLE + CRITIQUE_DIM   # 60
    feats = jax.random.normal(xkey, (B, total_dim), jnp.float32)
    # sample 1: whole variable block zero -> exercises valid_mask (attn row zeroed)
    feats = feats.at[1, OBS_DIM_FIXED:OBS_DIM_FIXED + OBS_DIM_VARIABLE].set(0.0)
    # sample 0: one zero token -> exercises key_padding_mask
    t0 = OBS_DIM_FIXED + 3 * VARIABLE_FEATURE_DIM
    feats = feats.at[0, t0:t0 + VARIABLE_FEATURE_DIM].set(0.0)

    pi, vf = attention_network_forward(feats, params)
    jax.block_until_ready((pi, vf))

    pi_ref, vf_ref = reference_forward(feats, params)
    assert pi.shape == (B, NET_ARCH[-1]) and vf.shape == (B, NET_ARCH[-1])
    assert bool(jnp.all(jnp.isfinite(pi))) and bool(jnp.all(jnp.isfinite(vf)))
    assert np.allclose(np.asarray(pi), np.asarray(pi_ref), atol=1e-2, rtol=1e-2)
    assert np.allclose(np.asarray(vf), np.asarray(vf_ref), atol=1e-2, rtol=1e-2)
    print("KERNEL_OK")
</pallas_src>

<mosaic_0001>
module attributes {stable_mosaic.version = 11 : i64} {
  func.func @fused_forward_kernel(%arg0: i32, %arg1: memref<8x12xf32, #tpu.memory_space<vmem>>, %arg2: memref<8x8x6xf32, #tpu.memory_space<vmem>>, %arg3: memref<6x64xf32, #tpu.memory_space<vmem>>, %arg4: memref<1x64xf32, #tpu.memory_space<vmem>>, %arg5: memref<64x16xf32, #tpu.memory_space<vmem>>, %arg6: memref<1x16xf32, #tpu.memory_space<vmem>>, %arg7: memref<64x256xf32, #tpu.memory_space<vmem>>, %arg8: memref<1x256xf32, #tpu.memory_space<vmem>>, %arg9: memref<16x256xf32, #tpu.memory_space<vmem>>, %arg10: memref<256x256xf32, #tpu.memory_space<vmem>>, %arg11: memref<1x256xf32, #tpu.memory_space<vmem>>, %arg12: memref<12x64xf32, #tpu.memory_space<vmem>>, %arg13: memref<256x64xf32, #tpu.memory_space<vmem>>, %arg14: memref<1x64xf32, #tpu.memory_space<vmem>>, %arg15: memref<64x64xf32, #tpu.memory_space<vmem>>, %arg16: memref<1x64xf32, #tpu.memory_space<vmem>>, %arg17: memref<8x64xf32, #tpu.memory_space<vmem>>) attributes {dimension_semantics = [#tpu.dimension_semantics<parallel>], iteration_bounds = array<i64: 1>, scalar_prefetch = 0 : i64, scratch_operands = 0 : i64, tpu.core_type = #tpu.core_type<tc>, window_params = [{transform_indices = @transform_0, window_bounds = array<i64: 8, 12>}, {transform_indices = @transform_1, window_bounds = array<i64: 8, 8, 6>}, {pipeline_mode = #tpu.pipeline_mode<synchronous>, transform_indices = @transform_2, window_bounds = array<i64: 6, 64>}, {pipeline_mode = #tpu.pipeline_mode<synchronous>, transform_indices = @transform_3, window_bounds = array<i64: 1, 64>}, {pipeline_mode = #tpu.pipeline_mode<synchronous>, transform_indices = @transform_4, window_bounds = array<i64: 64, 16>}, {pipeline_mode = #tpu.pipeline_mode<synchronous>, transform_indices = @transform_5, window_bounds = array<i64: 1, 16>}, {pipeline_mode = #tpu.pipeline_mode<synchronous>, transform_indices = @transform_6, window_bounds = array<i64: 64, 256>}, {pipeline_mode = #tpu.pipeline_mode<synchronous>, transform_indices = @transform_7, window_bounds = array<i64: 1, 256>}, {pipeline_mode = #tpu.pipeline_mode<synchronous>, transform_indices = @transform_8, window_bounds = array<i64: 16, 256>}, {pipeline_mode = #tpu.pipeline_mode<synchronous>, transform_indices = @transform_9, window_bounds = array<i64: 256, 256>}, {pipeline_mode = #tpu.pipeline_mode<synchronous>, transform_indices = @transform_10, window_bounds = array<i64: 1, 256>}, {pipeline_mode = #tpu.pipeline_mode<synchronous>, transform_indices = @transform_11, window_bounds = array<i64: 12, 64>}, {pipeline_mode = #tpu.pipeline_mode<synchronous>, transform_indices = @transform_12, window_bounds = array<i64: 256, 64>}, {pipeline_mode = #tpu.pipeline_mode<synchronous>, transform_indices = @transform_13, window_bounds = array<i64: 1, 64>}, {pipeline_mode = #tpu.pipeline_mode<synchronous>, transform_indices = @transform_14, window_bounds = array<i64: 64, 64>}, {pipeline_mode = #tpu.pipeline_mode<synchronous>, transform_indices = @transform_15, window_bounds = array<i64: 1, 64>}, {transform_indices = @transform_16, window_bounds = array<i64: 8, 64>}]} {
    %c0 = arith.constant 0 : index
    %c0_0 = arith.constant 0 : index
    %c0_1 = arith.constant 0 : index
    %0 = vector.load %arg2[%c0, %c0_0, %c0_1] : memref<8x8x6xf32, #tpu.memory_space<vmem>>, vector<8x8x6xf32>
    %1 = vector.shape_cast %0 : vector<8x8x6xf32> to vector<64x6xf32>
    %cst = arith.constant dense<0.000000e+00> : vector<8x8xf32>
    %2 = vector.multi_reduction <add>, %0, %cst [2] : vector<8x8x6xf32> to vector<8x8xf32>
    %3 = vector.shape_cast %2 : vector<8x8xf32> to vector<8x8x1xf32>
    %4 = math.absf %3 : vector<8x8x1xf32>
    %cst_2 = arith.constant 0.000000e+00 : f32
    %5 = vector.broadcast %cst_2 : f32 to vector<8x8x1xf32>
    %6 = arith.cmpf oeq, %4, %5 : vector<8x8x1xf32>
    %cst_3 = arith.constant dense<0.000000e+00> : vector<8x1xf32>
    %7 = vector.multi_reduction <add>, %3, %cst_3 [1] : vector<8x8x1xf32> to vector<8x1xf32>
    %8 = math.absf %7 : vector<8x1xf32>
    %cst_4 = arith.constant 0.000000e+00 : f32
    %9 = vector.broadcast %cst_4 : f32 to vector<8x1xf32>
    %10 = arith.cmpf one, %8, %9 : vector<8x1xf32>
    %c0_5 = arith.constant 0 : index
    %c0_6 = arith.constant 0 : index
    %11 = vector.load %arg3[%c0_5, %c0_6] : memref<6x64xf32, #tpu.memory_space<vmem>>, vector<6x64xf32>
    %cst_7 = arith.constant dense<0.000000e+00> : vector<64x64xf32>
    %12 = tpu.matmul %1, %11, %cst_7 {dimension_numbers = #tpu.dot_dimension_numbers<[1], [0], [0], [1], [0, 0, 1, 1], [], []>} : vector<64x6xf32>, vector<6x64xf32>, vector<64x64xf32> -> vector<64x64xf32>
    %c0_8 = arith.constant 0 : index
    %c0_9 = arith.constant 0 : index
    %13 = vector.load %arg4[%c0_8, %c0_9] : memref<1x64xf32, #tpu.memory_space<vmem>>, vector<1x64xf32>
    %14 = vector.broadcast %13 : vector<1x64xf32> to vector<64x64xf32>
    %15 = arith.addf %12, %14 : vector<64x64xf32>
    %cst_10 = arith.constant dense<0.000000e+00> : vector<64xf32>
    %16 = vector.multi_reduction <add>, %15, %cst_10 [1] : vector<64x64xf32> to vector<64xf32>
    %17 = vector.shape_cast %16 : vector<64xf32> to vector<64x1xf32>
    %cst_11 = arith.constant 6.400000e+01 : f32
    %18 = vector.broadcast %cst_11 : f32 to vector<64x1xf32>
    %19 = arith.divf %17, %18 : vector<64x1xf32>
    %20 = vector.broadcast %19 : vector<64x1xf32> to vector<64x64xf32>
    %21 = arith.subf %15, %20 : vector<64x64xf32>
    %22 = arith.mulf %21, %21 : vector<64x64xf32>
    %cst_12 = arith.constant dense<0.000000e+00> : vector<64xf32>
    %23 = vector.multi_reduction <add>, %22, %cst_12 [1] : vector<64x64xf32> to vector<64xf32>
    %24 = vector.shape_cast %23 : vector<64xf32> to vector<64x1xf32>
    %cst_13 = arith.constant 6.400000e+01 : f32
    %25 = vector.broadcast %cst_13 : f32 to vector<64x1xf32>
    %26 = arith.divf %24, %25 : vector<64x1xf32>
    %cst_14 = arith.constant 9.99999974E-6 : f32
    %27 = vector.broadcast %cst_14 : f32 to vector<64x1xf32>
    %28 = arith.addf %26, %27 : vector<64x1xf32>
    %29 = math.rsqrt %28 : vector<64x1xf32>
    %30 = vector.broadcast %29 : vector<64x1xf32> to vector<64x64xf32>
    %31 = arith.mulf %21, %30 : vector<64x64xf32>
    %c0_15 = arith.constant 0 : index
    %c0_16 = arith.constant 0 : index
    %32 = vector.load %arg5[%c0_15, %c0_16] : memref<64x16xf32, #tpu.memory_space<vmem>>, vector<64x16xf32>
    %cst_17 = arith.constant dense<0.000000e+00> : vector<64x16xf32>
    %33 = tpu.matmul %31, %32, %cst_17 {dimension_numbers = #tpu.dot_dimension_numbers<[1], [0], [0], [1], [0, 0, 1, 1], [], []>} : vector<64x64xf32>, vector<64x16xf32>, vector<64x16xf32> -> vector<64x16xf32>
    %c0_18 = arith.constant 0 : index
    %c0_19 = arith.constant 0 : index
    %34 = vector.load %arg6[%c0_18, %c0_19] : memref<1x16xf32, #tpu.memory_space<vmem>>, vector<1x16xf32>
    %35 = vector.broadcast %34 : vector<1x16xf32> to vector<64x16xf32>
    %36 = arith.addf %33, %35 : vector<64x16xf32>
    %37 = vector.shape_cast %36 : vector<64x16xf32> to vector<8x8x16xf32>
    %cst_20 = arith.constant -1.000000e+30 : f32
    %38 = vector.shape_cast %6 : vector<8x8x1xi1> to vector<8x8x1xi1>
    %39 = vector.broadcast %38 : vector<8x8x1xi1> to vector<8x8x16xi1>
    %40 = vector.broadcast %cst_20 : f32 to vector<8x8x16xf32>
    %41 = arith.select %39, %40, %37 : vector<8x8x16xi1>, vector<8x8x16xf32>
    %cst_21 = arith.constant dense<0xFF800000> : vector<8x16xf32>
    %42 = vector.multi_reduction <maximumf>, %41, %cst_21 [1] : vector<8x8x16xf32> to vector<8x16xf32>
    %43 = vector.shape_cast %42 : vector<8x16xf32> to vector<8x1x16xf32>
    %44 = vector.broadcast %43 : vector<8x1x16xf32> to vector<8x8x16xf32>
    %45 = arith.subf %41, %44 : vector<8x8x16xf32>
    %46 = math.exp %45 : vector<8x8x16xf32>
    %cst_22 = arith.constant dense<0.000000e+00> : vector<8x16xf32>
    %47 = vector.multi_reduction <add>, %46, %cst_22 [1] : vector<8x8x16xf32> to vector<8x16xf32>
    %48 = vector.shape_cast %47 : vector<8x16xf32> to vector<8x1x16xf32>
    %49 = tpu.reciprocal %48 {approx = true} : vector<8x1x16xf32> -> vector<8x1x16xf32>
    %50 = vector.broadcast %49 : vector<8x1x16xf32> to vector<8x8x16xf32>
    %51 = arith.mulf %46, %50 : vector<8x8x16xf32>
    %52 = vector.shape_cast %51 : vector<8x8x16xf32> to vector<64x16xf32>
    %c0_23 = arith.constant 0 : index
    %c0_24 = arith.constant 0 : index
    %53 = vector.load %arg9[%c0_23, %c0_24] : memref<16x256xf32, #tpu.memory_space<vmem>>, vector<16x256xf32>
    %cst_25 = arith.constant dense<0.000000e+00> : vector<64x256xf32>
    %54 = tpu.matmul %52, %53, %cst_25 {dimension_numbers = #tpu.dot_dimension_numbers<[1], [0], [0], [1], [0, 0, 1, 1], [], []>} : vector<64x16xf32>, vector<16x256xf32>, vector<64x256xf32> -> vector<64x256xf32>
    %c0_26 = arith.constant 0 : index
    %c0_27 = arith.constant 0 : index
    %55 = vector.load %arg7[%c0_26, %c0_27] : memref<64x256xf32, #tpu.memory_space<vmem>>, vector<64x256xf32>
    %cst_28 = arith.constant dense<0.000000e+00> : vector<64x256xf32>
    %56 = tpu.matmul %31, %55, %cst_28 {dimension_numbers = #tpu.dot_dimension_numbers<[1], [0], [0], [1], [0, 0, 1, 1], [], []>} : vector<64x64xf32>, vector<64x256xf32>, vector<64x256xf32> -> vector<64x256xf32>
    %c0_29 = arith.constant 0 : index
    %c0_30 = arith.constant 0 : index
    %57 = vector.load %arg8[%c0_29, %c0_30] : memref<1x256xf32, #tpu.memory_space<vmem>>, vector<1x256xf32>
    %58 = vector.broadcast %57 : vector<1x256xf32> to vector<64x256xf32>
    %59 = arith.addf %56, %58 : vector<64x256xf32>
    %60 = arith.mulf %54, %59 : vector<64x256xf32>
    %61 = vector.shape_cast %60 : vector<64x256xf32> to vector<8x8x256xf32>
    %cst_31 = arith.constant dense<0.000000e+00> : vector<8x256xf32>
    %62 = vector.multi_reduction <add>, %61, %cst_31 [1] : vector<8x8x256xf32> to vector<8x256xf32>
    %c0_32 = arith.constant 0 : index
    %c0_33 = arith.constant 0 : index
    %63 = vector.load %arg10[%c0_32, %c0_33] : memref<256x256xf32, #tpu.memory_space<vmem>>, vector<256x256xf32>
    %cst_34 = arith.constant dense<0.000000e+00> : vector<8x256xf32>
    %64 = tpu.matmul %62, %63, %cst_34 {dimension_numbers = #tpu.dot_dimension_numbers<[1], [0], [0], [1], [0, 0, 1, 1], [], []>} : vector<8x256xf32>, vector<256x256xf32>, vector<8x256xf32> -> vector<8x256xf32>
    %c0_35 = arith.constant 0 : index
    %c0_36 = arith.constant 0 : index
    %65 = vector.load %arg11[%c0_35, %c0_36] : memref<1x256xf32, #tpu.memory_space<vmem>>, vector<1x256xf32>
    %66 = vector.broadcast %65 : vector<1x256xf32> to vector<8x256xf32>
    %67 = arith.addf %64, %66 : vector<8x256xf32>
    %cst_37 = arith.constant 0.000000e+00 : f32
    %68 = vector.shape_cast %10 : vector<8x1xi1> to vector<8x1xi1>
    %69 = vector.broadcast %68 : vector<8x1xi1> to vector<8x256xi1>
    %70 = vector.broadcast %cst_37 : f32 to vector<8x256xf32>
    %71 = arith.select %69, %67, %70 : vector<8x256xi1>, vector<8x256xf32>
    %c0_38 = arith.constant 0 : index
    %c0_39 = arith.constant 0 : index
    %72 = vector.load %arg1[%c0_38, %c0_39] : memref<8x12xf32, #tpu.memory_space<vmem>>, vector<8x12xf32>
    %c0_40 = arith.constant 0 : index
    %c0_41 = arith.constant 0 : index
    %73 = vector.load %arg12[%c0_40, %c0_41] : memref<12x64xf32, #tpu.memory_space<vmem>>, vector<12x64xf32>
    %cst_42 = arith.constant dense<0.000000e+00> : vector<8x64xf32>
    %74 = tpu.matmul %72, %73, %cst_42 {dimension_numbers = #tpu.dot_dimension_numbers<[1], [0], [0], [1], [0, 0, 1, 1], [], []>} : vector<8x12xf32>, vector<12x64xf32>, vector<8x64xf32> -> vector<8x64xf32>
    %c0_43 = arith.constant 0 : index
    %c0_44 = arith.constant 0 : index
    %75 = vector.load %arg13[%c0_43, %c0_44] : memref<256x64xf32, #tpu.memory_space<vmem>>, vector<256x64xf32>
    %cst_45 = arith.constant dense<0.000000e+00> : vector<8x64xf32>
    %76 = tpu.matmul %71, %75, %cst_45 {dimension_numbers = #tpu.dot_dimension_numbers<[1], [0], [0], [1], [0, 0, 1, 1], [], []>} : vector<8x256xf32>, vector<256x64xf32>, vector<8x64xf32> -> vector<8x64xf32>
    %77 = arith.addf %74, %76 : vector<8x64xf32>
    %c0_46 = arith.constant 0 : index
    %c0_47 = arith.constant 0 : index
    %78 = vector.load %arg14[%c0_46, %c0_47] : memref<1x64xf32, #tpu.memory_space<vmem>>, vector<1x64xf32>
    %79 = vector.broadcast %78 : vector<1x64xf32> to vector<8x64xf32>
    %80 = arith.addf %77, %79 : vector<8x64xf32>
    %81 = math.tanh %80 : vector<8x64xf32>
    %c0_48 = arith.constant 0 : index
    %c0_49 = arith.constant 0 : index
    %82 = vector.load %arg15[%c0_48, %c0_49] : memref<64x64xf32, #tpu.memory_space<vmem>>, vector<64x64xf32>
    %cst_50 = arith.constant dense<0.000000e+00> : vector<8x64xf32>
    %83 = tpu.matmul %81, %82, %cst_50 {dimension_numbers = #tpu.dot_dimension_numbers<[1], [0], [0], [1], [0, 0, 1, 1], [], []>} : vector<8x64xf32>, vector<64x64xf32>, vector<8x64xf32> -> vector<8x64xf32>
    %c0_51 = arith.constant 0 : index
    %c0_52 = arith.constant 0 : index
    %84 = vector.load %arg16[%c0_51, %c0_52] : memref<1x64xf32, #tpu.memory_space<vmem>>, vector<1x64xf32>
    %85 = vector.broadcast %84 : vector<1x64xf32> to vector<8x64xf32>
    %86 = arith.addf %83, %85 : vector<8x64xf32>
    %87 = math.tanh %86 : vector<8x64xf32>
    %c0_53 = arith.constant 0 : index
    %c0_54 = arith.constant 0 : index
    %88 = vector.load %arg17[%c0_53, %c0_54] : memref<8x64xf32, #tpu.memory_space<vmem>>, vector<8x64xf32>
    tpu.vector_store %arg17[%c0_53, %c0_54], %87 {strides = array<i32>} : memref<8x64xf32, #tpu.memory_space<vmem>>, vector<8x64xf32>,
    return
  }
  func.func @transform_0(%arg0: i32) -> (i32, i32) {
    %c0_i32 = arith.constant 0 : i32
    %c0_i32_0 = arith.constant 0 : i32
    return %arg0, %c0_i32 : i32, i32
  }
  func.func @transform_1(%arg0: i32) -> (i32, i32, i32) {
    %c0_i32 = arith.constant 0 : i32
    %c0_i32_0 = arith.constant 0 : i32
    %c0_i32_1 = arith.constant 0 : i32
    return %arg0, %c0_i32, %c0_i32_0 : i32, i32, i32
  }
  func.func @transform_2(%arg0: i32) -> (i32, i32) {
    %c0_i32 = arith.constant 0 : i32
    %c0_i32_0 = arith.constant 0 : i32
    %c0_i32_1 = arith.constant 0 : i32
    return %c0_i32, %c0_i32_0 : i32, i32
  }
  func.func @transform_3(%arg0: i32) -> (i32, i32) {
    %c0_i32 = arith.constant 0 : i32
    %c0_i32_0 = arith.constant 0 : i32
    %c0_i32_1 = arith.constant 0 : i32
    return %c0_i32, %c0_i32_0 : i32, i32
  }
  func.func @transform_4(%arg0: i32) -> (i32, i32) {
    %c0_i32 = arith.constant 0 : i32
    %c0_i32_0 = arith.constant 0 : i32
    %c0_i32_1 = arith.constant 0 : i32
    return %c0_i32, %c0_i32_0 : i32, i32
  }
  func.func @transform_5(%arg0: i32) -> (i32, i32) {
    %c0_i32 = arith.constant 0 : i32
    %c0_i32_0 = arith.constant 0 : i32
    %c0_i32_1 = arith.constant 0 : i32
    return %c0_i32, %c0_i32_0 : i32, i32
  }
  func.func @transform_6(%arg0: i32) -> (i32, i32) {
    %c0_i32 = arith.constant 0 : i32
    %c0_i32_0 = arith.constant 0 : i32
    %c0_i32_1 = arith.constant 0 : i32
    return %c0_i32, %c0_i32_0 : i32, i32
  }
  func.func @transform_7(%arg0: i32) -> (i32, i32) {
    %c0_i32 = arith.constant 0 : i32
    %c0_i32_0 = arith.constant 0 : i32
    %c0_i32_1 = arith.constant 0 : i32
    return %c0_i32, %c0_i32_0 : i32, i32
  }
  func.func @transform_8(%arg0: i32) -> (i32, i32) {
    %c0_i32 = arith.constant 0 : i32
    %c0_i32_0 = arith.constant 0 : i32
    %c0_i32_1 = arith.constant 0 : i32
    return %c0_i32, %c0_i32_0 : i32, i32
  }
  func.func @transform_9(%arg0: i32) -> (i32, i32) {
    %c0_i32 = arith.constant 0 : i32
    %c0_i32_0 = arith.constant 0 : i32
    %c0_i32_1 = arith.constant 0 : i32
    return %c0_i32, %c0_i32_0 : i32, i32
  }
  func.func @transform_10(%arg0: i32) -> (i32, i32) {
    %c0_i32 = arith.constant 0 : i32
    %c0_i32_0 = arith.constant 0 : i32
    %c0_i32_1 = arith.constant 0 : i32
    return %c0_i32, %c0_i32_0 : i32, i32
  }
  func.func @transform_11(%arg0: i32) -> (i32, i32) {
    %c0_i32 = arith.constant 0 : i32
    %c0_i32_0 = arith.constant 0 : i32
    %c0_i32_1 = arith.constant 0 : i32
    return %c0_i32, %c0_i32_0 : i32, i32
  }
  func.func @transform_12(%arg0: i32) -> (i32, i32) {
    %c0_i32 = arith.constant 0 : i32
    %c0_i32_0 = arith.constant 0 : i32
    %c0_i32_1 = arith.constant 0 : i32
    return %c0_i32, %c0_i32_0 : i32, i32
  }
  func.func @transform_13(%arg0: i32) -> (i32, i32) {
    %c0_i32 = arith.constant 0 : i32
    %c0_i32_0 = arith.constant 0 : i32
    %c0_i32_1 = arith.constant 0 : i32
    return %c0_i32, %c0_i32_0 : i32, i32
  }
  func.func @transform_14(%arg0: i32) -> (i32, i32) {
    %c0_i32 = arith.constant 0 : i32
    %c0_i32_0 = arith.constant 0 : i32
    %c0_i32_1 = arith.constant 0 : i32
    return %c0_i32, %c0_i32_0 : i32, i32
  }
  func.func @transform_15(%arg0: i32) -> (i32, i32) {
    %c0_i32 = arith.constant 0 : i32
    %c0_i32_0 = arith.constant 0 : i32
    %c0_i32_1 = arith.constant 0 : i32
    return %c0_i32, %c0_i32_0 : i32, i32
  }
  func.func @transform_16(%arg0: i32) -> (i32, i32) {
    %c0_i32 = arith.constant 0 : i32
    %c0_i32_0 = arith.constant 0 : i32
    return %arg0, %c0_i32 : i32, i32
  }
}

</mosaic_0001>

<bundles_post_ra>
// kernel: tile.19
= control target key start
LH: loop header
LB: loop body
LE: loop exit
PB: predicated region body
PF: predicated region fallthrough
CT: control target
= control target key end

     0   :  { %vm644_vm0 = vcmask 1047556   ;;  %s389_s9 = smov 3  ;;  %s383_s12 = smov 3  ;;  %vm260_vm1 = vcmask 523264   ;;  %vm648_vm2 = vcmask 1048064   ;;  %s1512_s0 = inlined_call_operand.vmem [shape: f32[64,4,64], index: 0, kind: input, shape index: {}]   ;;  %s1513_s1 = inlined_call_operand.vmem [shape: f32[64,256], index: 1, kind: output, shape index: {}]  }
   0x1   :  { %v871_v0 = vld [vmem:[%s1512_s0 + $0x1c] sm:$0xf]  ;;  %v872_v1 = vld [vmem:[%s1512_s0 + $0x18] sm:$0xf]  ;;  %v873_v2 = vld [vmem:[%s1512_s0 + $0x14] sm:$0xf] }
   0x2   :  { %231 = vst [vmem:[#allocation0 + $0x38] sm:$0xf] %v871_v0  ;;  %v874_v3 = vld [vmem:[%s1512_s0 + $0x10] sm:$0xf]  ;;  %v875_v4 = vld [vmem:[%s1512_s0 + $0xc] sm:$0xf] }
   0x3   :  { %235 = vst [vmem:[#allocation0 + $0x30] sm:$0xf] %v872_v1  ;;  %v876_v5 = vld [vmem:[%s1512_s0 + $0x8] sm:$0xf]  ;;  %v877_v6 = vld [vmem:[%s1512_s0 + $0x4] sm:$0xf] }
   0x4   :  { %239 = vst [vmem:[#allocation0 + $0x28] sm:$0xf] %v873_v2  ;;  %v256_v7 = vld [vmem:[%s1512_s0] sm:$0xf]  ;;  %v855_v8 = vld [vmem:[%s1512_s0 + $0x5c] sm:$0xf] }
   0x5   :  { %243 = vst [vmem:[#allocation0 + $0x20] sm:$0xf] %v874_v3  ;;  %v856_v9 = vld [vmem:[%s1512_s0 + $0x58] sm:$0xf]  ;;  %v857_v10 = vld [vmem:[%s1512_s0 + $0x54] sm:$0xf] }
   0x6   :  { %247 = vst [vmem:[#allocation0 + $0x18] sm:$0xf] %v875_v4  ;;  %v858_v11 = vld [vmem:[%s1512_s0 + $0x50] sm:$0xf]  ;;  %v859_v12 = vld [vmem:[%s1512_s0 + $0x4c] sm:$0xf] }
   0x7   :  { %251 = vst [vmem:[#allocation0 + $0x10] sm:$0xf] %v876_v5  ;;  %v860_v13 = vld [vmem:[%s1512_s0 + $0x48] sm:$0xf]  ;;  %v861_v14 = vld [vmem:[%s1512_s0 + $0x44] sm:$0xf] }
   0x8   :  { %255 = vst [vmem:[#allocation0 + $0x8] sm:$0xf] %v877_v6  ;;  %v862_v15 = vld [vmem:[%s1512_s0 + $0x40] sm:$0xf]  ;;  %v839_v17 = vld [vmem:[%s1512_s0 + $0x9c] sm:$0xf] }
   0x9   :  { %257 = vst [vmem:[#allocation0] sm:$0xf] %v256_v7  ;;  %s377_s13 = smov 3  ;;  %s957_s14 = smov 64   ;;  %v840_v24 = vld [vmem:[%s1512_s0 + $0x98] sm:$0xf] }
   0xa   :  { %167 = vst [vmem:[#allocation0 + $0xb8] sm:$0xf] %v855_v8  ;;  %s371_s15 = smov 3  ;;  %s365_s16 = smov 3  ;;  %v841_v26 = vld [vmem:[%s1512_s0 + $0x94] sm:$0xf] }
   0xb   :  { %171 = vst [vmem:[#allocation0 + $0xb0] sm:$0xf] %v856_v9  ;;  %s359_s19 = smov 3  ;;  %s353_s22 = smov 3  ;;  %v842_v28 = vld [vmem:[%s1512_s0 + $0x90] sm:$0xf] }
   0xc   :  { %175 = vst [vmem:[#allocation0 + $0xa8] sm:$0xf] %v857_v10  ;;  %v643_v16 = vld [vmem:[#allocation0 + $0x1] ss:$8 sm:$0xf0]   ;;  %s479_s21 = smov 3 }
   0xd   :  { %179 = vst [vmem:[#allocation0 + $0xa0] sm:$0xf] %v858_v11  ;;  %v843_v30 = vld [vmem:[%s1512_s0 + $0x8c] sm:$0xf]  ;;  %v844_v34 = vld [vmem:[%s1512_s0 + $0x88] sm:$0xf] }
   0xe   :  { %183 = vst [vmem:[#allocation0 + $0x98] sm:$0xf] %v859_v12  ;;  %v845_v35 = vld [vmem:[%s1512_s0 + $0x84] sm:$0xf]  ;;  %v846_v36 = vld [vmem:[%s1512_s0 + $0x80] sm:$0xf] }
   0xf   :  { %187 = vst [vmem:[#allocation0 + $0x90] sm:$0xf] %v860_v13  ;;  %v847_v37 = vld [vmem:[%s1512_s0 + $0x7c] sm:$0xf]  ;;  %v838_v38 = vld [vmem:[%s1512_s0 + $0xa0] sm:$0xf] }
  0x10   :  { %v641_v18 = vld [vmem:[#allocation0 + $0x1] ss:$8 sm:$0xf]   ;;  %191 = vst [vmem:[#allocation0 + $0x88] sm:$0xf] %v861_v14  ;;  %s473_s24 = smov 3 }
  0x11   :  { %v645_v19 = vsel %vm644_vm0, %v643_v16, %v641_v18  ;;  %195 = vst [vmem:[#allocation0 + $0x80] sm:$0xf] %v862_v15  ;;  %s467_s25 = smov 3  ;;  %s461_s26 = smov 3  ;;  %v823_v47 = vld [vmem:[%s1512_s0 + $0xdc] sm:$0xf] }
  0x12   :  { %646 = vrot.lane.b32.xlu0 %v645_v19, %s957_s14  ;;  %v390_v20 = vld [vmem:[#allocation0 + $0xb0] ss:$2 sm:%s389_s9]   ;;  %103 = vst [vmem:[#allocation0 + $0x138] sm:$0xf] %v839_v17  ;;  %s485_s27 = smov 3  ;;  %s455_s28 = smov 3 }
  0x13   :  { %v384_v21 = vld [vmem:[#allocation0 + $0xa8] ss:$2 sm:%s383_s12]   ;;  %899 = vst.msk [vmem:[%s1513_s1 + $0x26] ss:$8 sm:$0x3] %vm260_vm1, %v390_v20   ;;  %s449_s2 = smov 3 }
  0x14   :  { %v378_v22 = vld [vmem:[#allocation0 + $0xa0] ss:$2 sm:%s377_s13]   ;;  %898 = vst.msk [vmem:[%s1513_s1 + $0x25] ss:$8 sm:$0x3] %vm260_vm1, %v384_v21   ;;  %s443_s5 = smov 3 }
  0x15   :  { %v372_v23 = vld [vmem:[#allocation0 + $0x98] ss:$2 sm:%s371_s15]   ;;  %897 = vst.msk [vmem:[%s1513_s1 + $0x24] ss:$8 sm:$0x3] %vm260_vm1, %v378_v22   ;;  %s491_s15 = smov 3 }
  0x16   :  { %v366_v25 = vld [vmem:[#allocation0 + $0x90] ss:$2 sm:%s365_s16]   ;;  %896 = vst.msk [vmem:[%s1513_s1 + $0x23] ss:$8 sm:$0x3] %vm260_vm1, %v372_v23   ;;  %s581_s9 = smov 3 }
  0x17   :  { %v360_v27 = vld [vmem:[#allocation0 + $0x88] ss:$2 sm:%s359_s19]   ;;  %895 = vst.msk [vmem:[%s1513_s1 + $0x22] ss:$8 sm:$0x3] %vm260_vm1, %v366_v25   ;;  %s575_s12 = smov 3 }
  0x18   :  { %v354_v29 = vld [vmem:[#allocation0 + $0x80] ss:$2 sm:%s353_s22]   ;;  %894 = vst.msk [vmem:[%s1513_s1 + $0x21] ss:$8 sm:$0x3] %vm260_vm1, %v360_v27   ;;  %s569_s13 = smov 3 }
  0x19   :  { %893 = vst.msk [vmem:[%s1513_s1 + $0x20] ss:$8 sm:$0x3] %vm260_vm1, %v354_v29   ;;  %v651_v31 = vld [vmem:[#allocation0 + $0x81] ss:$8 sm:$0xf]  }
  0x1a   :  { %v653_v32 = vld [vmem:[#allocation0 + $0x81] ss:$8 sm:$0xf0]   ;;  %107 = vst [vmem:[#allocation0 + $0x130] sm:$0xf] %v840_v24  ;;  %s557_s16 = smov 3 }
  0x1b   :  { %v655_v33 = vsel %vm644_vm0, %v653_v32, %v651_v31  ;;  %111 = vst [vmem:[#allocation0 + $0x128] sm:$0xf] %v841_v26  ;;  %v824_v49 = vld [vmem:[%s1512_s0 + $0xd8] sm:$0xf]  ;;  %v825_v51 = vld [vmem:[%s1512_s0 + $0xd4] sm:$0xf] }
  0x1c   :  { %656 = vrot.lane.b32.xlu0 %v655_v33, %s957_s14  ;;  %115 = vst [vmem:[#allocation0 + $0x120] sm:$0xf] %v842_v28  ;;  %v826_v57 = vld [vmem:[%s1512_s0 + $0xd0] sm:$0xf]  ;;  %v827_v58 = vld [vmem:[%s1512_s0 + $0xcc] sm:$0xf] }
  0x1d   :  { %119 = vst [vmem:[#allocation0 + $0x118] sm:$0xf] %v843_v30  ;;  %v828_v59 = vld [vmem:[%s1512_s0 + $0xc8] sm:$0xf]  ;;  %v829_v60 = vld [vmem:[%s1512_s0 + $0xc4] sm:$0xf] }
  0x1e   :  { %123 = vst [vmem:[#allocation0 + $0x110] sm:$0xf] %v844_v34  ;;  %v830_v61 = vld [vmem:[%s1512_s0 + $0xc0] sm:$0xf]  ;;  %s551_s19 = smov 3  ;;  %s545_s22 = smov 3 }
  0x1f   :  { %127 = vst [vmem:[#allocation0 + $0x108] sm:$0xf] %v845_v35  ;;  %v822_v62 = vld [vmem:[%s1512_s0 + $0xe0] sm:$0xf]  ;;  %s587_s29 = smov 3  ;;  %s347_s3 = smov 3 }
  0x20   :  { %131 = vst [vmem:[#allocation0 + $0x100] sm:$0xf] %v846_v36  ;;  %v684_v63 = vld [vmem:[#allocation0 + $0x3] ss:$8 sm:$0xf]   ;;  %s341_s4 = smov 3 }
  0x21   :  { %135 = vst [vmem:[#allocation0 + $0xf8] sm:$0xf] %v847_v37  ;;  %v486_v43 = vld [vmem:[#allocation0 + $0x130] ss:$2 sm:%s485_s27]   ;;  %v851_v16 = vld [vmem:[%s1512_s0 + $0x6c] sm:$0xf] }
  0x22   :  { %v480_v39 = vld [vmem:[#allocation0 + $0x128] ss:$2 sm:%s479_s21]   ;;  %99 = vst [vmem:[#allocation0 + $0x140] sm:$0xf] %v838_v38  ;;  %v848_v8 = vld [vmem:[%s1512_s0 + $0x78] sm:$0xf] }
  0x23   :  { %v474_v40 = vld [vmem:[#allocation0 + $0x120] ss:$2 sm:%s473_s24]   ;;  %914 = vst.msk [vmem:[%s1513_s1 + $0x45] ss:$8 sm:$0x3] %vm260_vm1, %v480_v39   ;;  %s263_s21 = smov 3 }
  0x24   :  { %v468_v41 = vld [vmem:[#allocation0 + $0x118] ss:$2 sm:%s467_s25]   ;;  %913 = vst.msk [vmem:[%s1513_s1 + $0x44] ss:$8 sm:$0x3] %vm260_vm1, %v474_v40   ;;  %s275_s25 = smov 3 }
  0x25   :  { %v462_v42 = vld [vmem:[#allocation0 + $0x110] ss:$2 sm:%s461_s26]   ;;  %912 = vst.msk [vmem:[%s1513_s1 + $0x43] ss:$8 sm:$0x3] %vm260_vm1, %v468_v41   ;;  %s281_s26 = smov 3 }
  0x26   :  { %v456_v44 = vld [vmem:[#allocation0 + $0x108] ss:$2 sm:%s455_s28]   ;;  %911 = vst.msk [vmem:[%s1513_s1 + $0x42] ss:$8 sm:$0x3] %vm260_vm1, %v462_v42   ;;  %s287_s27 = smov 3 }
  0x27   :  { %v450_v45 = vld [vmem:[#allocation0 + $0x100] ss:$2 sm:%s449_s2]   ;;  %910 = vst.msk [vmem:[%s1513_s1 + $0x41] ss:$8 sm:$0x3] %vm260_vm1, %v456_v44   ;;  %s293_s28 = smov 3 }
  0x28   :  { %v444_v46 = vld [vmem:[#allocation0 + $0xf8] ss:$2 sm:%s443_s5]   ;;  %909 = vst.msk [vmem:[%s1513_s1 + $0x40] ss:$8 sm:$0x3] %vm260_vm1, %v450_v45   ;;  %s335_s7 = smov 3 }
  0x29   :  { %908 = vst.msk [vmem:[%s1513_s1 + $0x37] ss:$8 sm:$0x3] %vm260_vm1, %v444_v46   ;;  %v662_v48 = vld [vmem:[#allocation0 + $0x101] ss:$8 sm:$0xf]  }
  0x2a   :  { %v664_v50 = vld [vmem:[#allocation0 + $0x101] ss:$8 sm:$0xf0]   ;;  %915 = vst.msk [vmem:[%s1513_s1 + $0x46] ss:$8 sm:$0x3] %vm260_vm1, %v486_v43  }
  0x2b   :  { %v666_v52 = vsel %vm644_vm0, %v664_v50, %v662_v48  ;;  %v492_v53 = vld [vmem:[#allocation0 + $0x138] ss:$2 sm:%s491_s15]   ;;  %v706_v54 = vld [vmem:[#allocation0 + $0x103] ss:$8 sm:$0xf]   ;;  %s563_s15 = smov 3 }
  0x2c   :  { %667 = vrot.lane.b32.xlu1 %v666_v52, %s957_s14  ;;  %916 = vst.msk [vmem:[%s1513_s1 + $0x47] ss:$8 sm:$0x3] %vm260_vm1, %v492_v53   ;;  %v708_v55 = vld [vmem:[#allocation0 + $0x103] ss:$8 sm:$0xf0]  }
  0x2d   :  { %v710_v56 = vsel %vm644_vm0, %v708_v55, %v706_v54  ;;  %39 = vst [vmem:[#allocation0 + $0x1b8] sm:$0xf] %v823_v47  ;;  %v686_v0 = vld [vmem:[#allocation0 + $0x3] ss:$8 sm:$0xf0]   ;;  %s329_s8 = smov 3 }
  0x2e   :  { %711 = vrot.lane.b32.xlu0 %v710_v56, %s957_s14  ;;  %43 = vst [vmem:[#allocation0 + $0x1b0] sm:$0xf] %v824_v49  ;;  %v688_v2 = vsel %vm644_vm0, %v686_v0, %v684_v63  ;;  %v849_v10 = vld [vmem:[%s1512_s0 + $0x74] sm:$0xf]  ;;  %v850_v12 = vld [vmem:[%s1512_s0 + $0x70] sm:$0xf] }
  0x2f   :  { %47 = vst [vmem:[#allocation0 + $0x1a8] sm:$0xf] %v825_v51  ;;  %689 = vrot.lane.b32.xlu2 %v688_v2, %s957_s14  ;;  %v852_v17 = vld [vmem:[%s1512_s0 + $0x68] sm:$0xf]  ;;  %v853_v18 = vld [vmem:[%s1512_s0 + $0x64] sm:$0xf] }
  0x30   :  { %51 = vst [vmem:[#allocation0 + $0x1a0] sm:$0xf] %v826_v57  ;;  %v854_v21 = vld [vmem:[%s1512_s0 + $0x60] sm:$0xf]  ;;  %v264_v24 = vld [vmem:[#allocation0 + $0x8] ss:$2 sm:%s263_s21]  }
  0x31   :  { %55 = vst [vmem:[#allocation0 + $0x198] sm:$0xf] %v827_v58  ;;  %v276_v26 = vld [vmem:[#allocation0 + $0x18] ss:$2 sm:%s275_s25]   ;;  %v288_v28 = vld [vmem:[#allocation0 + $0x28] ss:$2 sm:%s287_s27]  }
  0x32   :  { %59 = vst [vmem:[#allocation0 + $0x190] sm:$0xf] %v828_v59  ;;  %v282_v27 = vld [vmem:[#allocation0 + $0x20] ss:$2 sm:%s281_s26]   ;;  %v294_v30 = vld [vmem:[#allocation0 + $0x30] ss:$2 sm:%s293_s28]  }
  0x33   :  { %63 = vst [vmem:[#allocation0 + $0x188] sm:$0xf] %v829_v60  ;;  %v870_v29 = vld [vmem:[%s1512_s0 + $0x20] sm:$0xf]  ;;  %v863_v31 = vld [vmem:[%s1512_s0 + $0x3c] sm:$0xf] }
  0x34   :  { %67 = vst [vmem:[#allocation0 + $0x180] sm:$0xf] %v830_v61  ;;  %v864_v33 = vld [vmem:[%s1512_s0 + $0x38] sm:$0xf]  ;;  %v865_v34 = vld [vmem:[%s1512_s0 + $0x34] sm:$0xf] }
  0x35   :  { %35 = vst [vmem:[#allocation0 + $0x1c0] sm:$0xf] %v822_v62  ;;  %v582_v1 = vld [vmem:[#allocation0 + $0x1b0] ss:$2 sm:%s581_s9]   ;;  %v867_v40 = vld [vmem:[%s1512_s0 + $0x2c] sm:$0xf] }
  0x36   :  { %v576_v3 = vld [vmem:[#allocation0 + $0x1a8] ss:$2 sm:%s575_s12]   ;;  %931 = vst.msk [vmem:[%s1513_s1 + $0x66] ss:$8 sm:$0x3] %vm260_vm1, %v582_v1   ;;  %s299_s27 = smov 3 }
  0x37   :  { %v570_v4 = vld [vmem:[#allocation0 + $0x1a0] ss:$2 sm:%s569_s13]   ;;  %930 = vst.msk [vmem:[%s1513_s1 + $0x65] ss:$8 sm:$0x3] %vm260_vm1, %v576_v3   ;;  %s323_s9 = smov 3 }
  0x38   :  { %v564_v5 = vld [vmem:[#allocation0 + $0x198] ss:$2 sm:%s563_s15]   ;;  %929 = vst.msk [vmem:[%s1513_s1 + $0x64] ss:$8 sm:$0x3] %vm260_vm1, %v570_v4   ;;  %s317_s12 = smov 3 }
  0x39   :  { %v558_v6 = vld [vmem:[#allocation0 + $0x190] ss:$2 sm:%s557_s16]   ;;  %928 = vst.msk [vmem:[%s1513_s1 + $0x63] ss:$8 sm:$0x3] %vm260_vm1, %v564_v5   ;;  %s258_s16 = smov 3 }
  0x3a   :  { %v552_v7 = vld [vmem:[#allocation0 + $0x188] ss:$2 sm:%s551_s19]   ;;  %927 = vst.msk [vmem:[%s1513_s1 + $0x62] ss:$8 sm:$0x3] %vm260_vm1, %v558_v6   ;;  %s305_s18 = smov 3 }
  0x3b   :  { %v546_v9 = vld [vmem:[#allocation0 + $0x180] ss:$2 sm:%s545_s22]   ;;  %926 = vst.msk [vmem:[%s1513_s1 + $0x61] ss:$8 sm:$0x3] %vm260_vm1, %v552_v7   ;;  %s269_s22 = smov 3 }
  0x3c   :  { %925 = vst.msk [vmem:[%s1513_s1 + $0x60] ss:$8 sm:$0x3] %vm260_vm1, %v546_v9   ;;  %v673_v11 = vld [vmem:[#allocation0 + $0x181] ss:$8 sm:$0xf]  }
  0x3d   :  { %v675_v13 = vld [vmem:[#allocation0 + $0x181] ss:$8 sm:$0xf0]   ;;  %v588_v14 = vld [vmem:[#allocation0 + $0x1b8] ss:$2 sm:%s587_s29]   ;;  %s311_s21 = smov 3 }
  0x3e   :  { %v677_v15 = vsel %vm644_vm0, %v675_v13, %v673_v11  ;;  %932 = vst.msk [vmem:[%s1513_s1 + $0x67] ss:$8 sm:$0x3] %vm260_vm1, %v588_v14   ;;  %v717_v19 = vld [vmem:[#allocation0 + $0x183] ss:$8 sm:$0xf]  }
  0x3f   :  { %678 = vrot.lane.b32.xlu1 %v677_v15, %s957_s14  ;;  %139 = vst [vmem:[#allocation0 + $0xf0] sm:$0xf] %v848_v8  ;;  %v719_v20 = vld [vmem:[#allocation0 + $0x183] ss:$8 sm:$0xf0]   ;;  %s395_s28 = smov 3 }
  0x40   :  { %143 = vst [vmem:[#allocation0 + $0xe8] sm:$0xf] %v849_v10  ;;  %v259_v22 = vld [vmem:[#allocation0] ss:$2 sm:%s258_s16]   ;;  %v721_v23 = vsel %vm644_vm0, %v719_v20, %v717_v19  ;;  %v270_v25 = vld [vmem:[#allocation0 + $0x10] ss:$2 sm:%s269_s22]  }
  0x41   :  { %147 = vst [vmem:[#allocation0 + $0xe0] sm:$0xf] %v850_v12  ;;  %v866_v36 = vld [vmem:[%s1512_s0 + $0x30] sm:$0xf]  ;;  %v868_v42 = vld [vmem:[%s1512_s0 + $0x28] sm:$0xf] }
  0x42   :  { %151 = vst [vmem:[#allocation0 + $0xd8] sm:$0xf] %v851_v16  ;;  %v695_v38 = vld [vmem:[#allocation0 + $0x83] ss:$8 sm:$0xf]   ;;  %s401_s15 = smov 3 }
  0x43   :  { %155 = vst [vmem:[#allocation0 + $0xd0] sm:$0xf] %v852_v17  ;;  %v697_v39 = vld [vmem:[#allocation0 + $0x83] ss:$8 sm:$0xf0]   ;;  %s407_s16 = smov 3 }
  0x44   :  { %159 = vst [vmem:[#allocation0 + $0xc8] sm:$0xf] %v853_v18  ;;  %v699_v41 = vsel %vm644_vm0, %v697_v39, %v695_v38  ;;  %v869_v43 = vld [vmem:[%s1512_s0 + $0x24] sm:$0xf]  ;;  %v831_v48 = vld [vmem:[%s1512_s0 + $0xbc] sm:$0xf] }
  0x45   :  { %163 = vst [vmem:[#allocation0 + $0xc0] sm:$0xf] %v854_v21  ;;  %700 = vrot.lane.b32.xlu2 %v699_v41, %s957_s14  ;;  %v832_v52 = vld [vmem:[%s1512_s0 + $0xb8] sm:$0xf]  ;;  %v833_v54 = vld [vmem:[%s1512_s0 + $0xb4] sm:$0xf] }
  0x46   :  { %261 = vst.msk [vmem:[%s1513_s1] ss:$8 sm:$0x3] %vm260_vm1, %v259_v22   ;;  %v834_v57 = vld [vmem:[%s1512_s0 + $0xb0] sm:$0xf]  ;;  %s413_s19 = smov 3 }
  0x47   :  { %722 = vrot.lane.b32.xlu1 %v721_v23, %s957_s14  ;;  %878 = vst.msk [vmem:[%s1513_s1 + $0x1] ss:$8 sm:$0x3] %vm260_vm1, %v264_v24   ;;  %v835_v60 = vld [vmem:[%s1512_s0 + $0xac] sm:$0xf]  ;;  %s419_s20 = smov 3 }
  0x48   :  { %879 = vst.msk [vmem:[%s1513_s1 + $0x2] ss:$8 sm:$0x3] %vm260_vm1, %v270_v25   ;;  %v741_v32 = vld [vmem:[#allocation0 + $0xc1] ss:$8 sm:$0xf0]  }
  0x49   :  { %880 = vst.msk [vmem:[%s1513_s1 + $0x3] ss:$8 sm:$0x3] %vm260_vm1, %v276_v26   ;;  %v836_v61 = vld [vmem:[%s1512_s0 + $0xa8] sm:$0xf]  ;;  %s431_s22 = smov 3 }
  0x4a   :  { %881 = vst.msk [vmem:[%s1513_s1 + $0x4] ss:$8 sm:$0x3] %vm260_vm1, %v282_v27   ;;  %v837_v62 = vld [vmem:[%s1512_s0 + $0xa4] sm:$0xf]  ;;  %s437_s25 = smov 3 }
  0x4b   :  { %882 = vst.msk [vmem:[%s1513_s1 + $0x5] ss:$8 sm:$0x3] %vm260_vm1, %v288_v28   ;;  %v408_v4 = vld [vmem:[#allocation0 + $0xc8] ss:$2 sm:%s407_s16]   ;;  %s599_s29 = smov 3 }
  0x4c   :  { %v739_v35 = vld [vmem:[#allocation0 + $0xc1] ss:$8 sm:$0xf]   ;;  %227 = vst [vmem:[#allocation0 + $0x40] sm:$0xf] %v870_v29  ;;  %s605_s30 = smov 3 }
  0x4d   :  { %v743_v37 = vsel %vm644_vm0, %v741_v32, %v739_v35  ;;  %883 = vst.msk [vmem:[%s1513_s1 + $0x6] ss:$8 sm:$0x3] %vm260_vm1, %v294_v30   ;;  %v396_v63 = vld [vmem:[#allocation0 + $0xb8] ss:$2 sm:%s395_s28]   ;;  %s629_s28 = smov 3 }
  0x4e   :  { %744 = vrot.lane.b32.xlu0 %v743_v37, %s957_s14  ;;  %199 = vst [vmem:[#allocation0 + $0x78] sm:$0xf] %v863_v31  ;;  %v402_v2 = vld [vmem:[#allocation0 + $0xc0] ss:$2 sm:%s401_s15]   ;;  %v414_v5 = vld [vmem:[#allocation0 + $0xd0] ss:$2 sm:%s413_s19]  }
  0x4f   :  { %203 = vst [vmem:[#allocation0 + $0x70] sm:$0xf] %v864_v33  ;;  %v420_v6 = vld [vmem:[#allocation0 + $0xd8] ss:$2 sm:%s419_s20]   ;;  %v432_v8 = vld [vmem:[#allocation0 + $0xe8] ss:$2 sm:%s431_s22]  }
  0x50   :  { %207 = vst [vmem:[#allocation0 + $0x68] sm:$0xf] %v865_v34  ;;  %v438_v9 = vld [vmem:[#allocation0 + $0xf0] ss:$2 sm:%s437_s25]   ;;  %v819_v19 = vld [vmem:[%s1512_s0 + $0xec] sm:$0xf] }
  0x51   :  { %211 = vst [vmem:[#allocation0 + $0x60] sm:$0xf] %v866_v36  ;;  %v815_v10 = vld [vmem:[%s1512_s0 + $0xfc] sm:$0xf]  ;;  %v816_v12 = vld [vmem:[%s1512_s0 + $0xf8] sm:$0xf] }
  0x52   :  { %215 = vst [vmem:[#allocation0 + $0x58] sm:$0xf] %v867_v40  ;;  %v817_v15 = vld [vmem:[%s1512_s0 + $0xf4] sm:$0xf]  ;;  %v818_v18 = vld [vmem:[%s1512_s0 + $0xf0] sm:$0xf] }
  0x53   :  { %v300_v44 = vld [vmem:[#allocation0 + $0x38] ss:$2 sm:%s299_s27]   ;;  %219 = vst [vmem:[#allocation0 + $0x50] sm:$0xf] %v868_v42  ;;  %s497_s22 = smov 3  ;;  %s593_s27 = smov 3 }
  0x54   :  { %884 = vst.msk [vmem:[%s1513_s1 + $0x7] ss:$8 sm:$0x3] %vm260_vm1, %v300_v44   ;;  %v783_v16 = vld [vmem:[#allocation0 + $0xc3] ss:$8 sm:$0xf]  }
  0x55   :  { %223 = vst [vmem:[#allocation0 + $0x48] sm:$0xf] %v869_v43  ;;  %v348_v45 = vld [vmem:[#allocation0 + $0x78] ss:$2 sm:%s347_s3]   ;;  %v820_v20 = vld [vmem:[%s1512_s0 + $0xe8] sm:$0xf] }
  0x56   :  { %v342_v46 = vld [vmem:[#allocation0 + $0x70] ss:$2 sm:%s341_s4]   ;;  %892 = vst.msk [vmem:[%s1513_s1 + $0x17] ss:$8 sm:$0x3] %vm260_vm1, %v348_v45   ;;  %s617_s2 = smov 3 }
  0x57   :  { %v336_v47 = vld [vmem:[#allocation0 + $0x68] ss:$2 sm:%s335_s7]   ;;  %891 = vst.msk [vmem:[%s1513_s1 + $0x16] ss:$8 sm:$0x3] %vm260_vm1, %v342_v46   ;;  %s611_s5 = smov 3 }
  0x58   :  { %v330_v49 = vld [vmem:[#allocation0 + $0x60] ss:$2 sm:%s329_s8]   ;;  %890 = vst.msk [vmem:[%s1513_s1 + $0x15] ss:$8 sm:$0x3] %vm260_vm1, %v336_v47   ;;  %s623_s8 = smov 3 }
  0x59   :  { %v324_v50 = vld [vmem:[#allocation0 + $0x58] ss:$2 sm:%s323_s9]   ;;  %889 = vst.msk [vmem:[%s1513_s1 + $0x14] ss:$8 sm:$0x3] %vm260_vm1, %v330_v49   ;;  %s503_s11 = smov 3 }
  0x5a   :  { %v318_v51 = vld [vmem:[#allocation0 + $0x50] ss:$2 sm:%s317_s12]   ;;  %888 = vst.msk [vmem:[%s1513_s1 + $0x13] ss:$8 sm:$0x3] %vm260_vm1, %v324_v50   ;;  %s509_s12 = smov 3 }
  0x5b   :  { %887 = vst.msk [vmem:[%s1513_s1 + $0x12] ss:$8 sm:$0x3] %vm260_vm1, %v318_v51   ;;  %v774_v53 = vld [vmem:[#allocation0 + $0x43] ss:$8 sm:$0xf0]  }
  0x5c   :  { %v306_v55 = vld [vmem:[#allocation0 + $0x40] ss:$2 sm:%s305_s18]   ;;  %71 = vst [vmem:[#allocation0 + $0x178] sm:$0xf] %v831_v48  ;;  %s515_s16 = smov 3  ;;  %s521_s19 = smov 3 }
  0x5d   :  { %v312_v56 = vld [vmem:[#allocation0 + $0x48] ss:$2 sm:%s311_s21]   ;;  %885 = vst.msk [vmem:[%s1513_s1 + $0x10] ss:$8 sm:$0x3] %vm260_vm1, %v306_v55   ;;  %s425_s21 = smov 3 }
  0x5e   :  { %v772_v58 = vld [vmem:[#allocation0 + $0x43] ss:$8 sm:$0xf]   ;;  %886 = vst.msk [vmem:[%s1513_s1 + $0x11] ss:$8 sm:$0x3] %vm260_vm1, %v312_v56  }
  0x5f   :  { %v776_v59 = vsel %vm644_vm0, %v774_v53, %v772_v58  ;;  %75 = vst [vmem:[#allocation0 + $0x170] sm:$0xf] %v832_v52  ;;  %v728_v0 = vld [vmem:[#allocation0 + $0x41] ss:$8 sm:$0xf]   ;;  %s527_s20 = smov 3 }
  0x60   :  { %777 = vrot.lane.b32.xlu0 %v776_v59, %s957_s14  ;;  %79 = vst [vmem:[#allocation0 + $0x168] sm:$0xf] %v833_v54  ;;  %v730_v1 = vld [vmem:[#allocation0 + $0x41] ss:$8 sm:$0xf0]   ;;  %s533_s23 = smov 3 }
  0x61   :  { %83 = vst [vmem:[#allocation0 + $0x160] sm:$0xf] %v834_v57  ;;  %v732_v3 = vsel %vm644_vm0, %v730_v1, %v728_v0  ;;  %v426_v7 = vld [vmem:[#allocation0 + $0xe0] ss:$2 sm:%s425_s21]  }
  0x62   :  { %87 = vst [vmem:[#allocation0 + $0x158] sm:$0xf] %v835_v60  ;;  %733 = vrot.lane.b32.xlu2 %v732_v3, %s957_s14  ;;  %v785_v17 = vld [vmem:[#allocation0 + $0xc3] ss:$8 sm:$0xf0]  }
  0x63   :  { %91 = vst [vmem:[#allocation0 + $0x150] sm:$0xf] %v836_v61  ;;  %v821_v21 = vld [vmem:[%s1512_s0 + $0xe4] sm:$0xf]  ;;  %s635_s0 = smov 3  ;;  %v787_v23 = vsel %vm644_vm0, %v785_v17, %v783_v16 }
  0x64   :  { %95 = vst [vmem:[#allocation0 + $0x148] sm:$0xf] %v837_v62 }
  0x65   :  { %900 = vst.msk [vmem:[%s1513_s1 + $0x27] ss:$8 sm:$0x3] %vm260_vm1, %v396_v63  }
  0x66   :  { %901 = vst.msk [vmem:[%s1513_s1 + $0x30] ss:$8 sm:$0x3] %vm260_vm1, %v402_v2   ;;  %v534_v43 = vld [vmem:[#allocation0 + $0x170] ss:$2 sm:%s533_s23]  }
  0x67   :  { %902 = vst.msk [vmem:[%s1513_s1 + $0x31] ss:$8 sm:$0x3] %vm260_vm1, %v408_v4   ;;  %v528_v41 = vld [vmem:[#allocation0 + $0x168] ss:$2 sm:%s527_s20]  }
  0x68   :  { %903 = vst.msk [vmem:[%s1513_s1 + $0x32] ss:$8 sm:$0x3] %vm260_vm1, %v414_v5   ;;  %v752_v11 = vld [vmem:[#allocation0 + $0x141] ss:$8 sm:$0xf0]  }
  0x69   :  { %904 = vst.msk [vmem:[%s1513_s1 + $0x33] ss:$8 sm:$0x3] %vm260_vm1, %v420_v6   ;;  %v516_v40 = vld [vmem:[#allocation0 + $0x158] ss:$2 sm:%s515_s16]  }
  0x6a   :  { %905 = vst.msk [vmem:[%s1513_s1 + $0x34] ss:$8 sm:$0x3] %vm260_vm1, %v426_v7   ;;  %v510_v36 = vld [vmem:[#allocation0 + $0x150] ss:$2 sm:%s509_s12]  }
  0x6b   :  { %v750_v13 = vld [vmem:[#allocation0 + $0x141] ss:$8 sm:$0xf]   ;;  %906 = vst.msk [vmem:[%s1513_s1 + $0x35] ss:$8 sm:$0x3] %vm260_vm1, %v432_v8  }
  0x6c   :  { %v754_v14 = vsel %vm644_vm0, %v752_v11, %v750_v13  ;;  %907 = vst.msk [vmem:[%s1513_s1 + $0x36] ss:$8 sm:$0x3] %vm260_vm1, %v438_v9   ;;  %v498_v22 = vld [vmem:[#allocation0 + $0x140] ss:$2 sm:%s497_s22]  }
  0x6d   :  { %755 = vrot.lane.b32.xlu1 %v754_v14, %s957_s14  ;;  %7 = vst [vmem:[#allocation0 + $0x1f8] sm:$0xf] %v815_v10  ;;  %v504_v33 = vld [vmem:[#allocation0 + $0x148] ss:$2 sm:%s503_s11]  }
  0x6e   :  { %11 = vst [vmem:[#allocation0 + $0x1f0] sm:$0xf] %v816_v12  ;;  %v522_v42 = vld [vmem:[#allocation0 + $0x160] ss:$2 sm:%s521_s19]  }
  0x6f   :  { %15 = vst [vmem:[#allocation0 + $0x1e8] sm:$0xf] %v817_v15  ;;  %v794_v44 = vld [vmem:[#allocation0 + $0x143] ss:$8 sm:$0xf]  }
  0x70   :  { %19 = vst [vmem:[#allocation0 + $0x1e0] sm:$0xf] %v818_v18  ;;  %v796_v45 = vld [vmem:[#allocation0 + $0x143] ss:$8 sm:$0xf0]  }
  0x71   :  { %23 = vst [vmem:[#allocation0 + $0x1d8] sm:$0xf] %v819_v19  ;;  %v798_v47 = vsel %vm644_vm0, %v796_v45, %v794_v44 }
  0x72   :  { %27 = vst [vmem:[#allocation0 + $0x1d0] sm:$0xf] %v820_v20 }
  0x73   :  { %31 = vst [vmem:[#allocation0 + $0x1c8] sm:$0xf] %v821_v21 }
  0x74   :  { %v636_v24 = vld [vmem:[#allocation0 + $0x1f8] ss:$2 sm:%s635_s0]   ;;  %917 = vst.msk [vmem:[%s1513_s1 + $0x50] ss:$8 sm:$0x3] %vm260_vm1, %v498_v22  }
  0x75   :  { %788 = vrot.lane.b32.xlu1 %v787_v23, %s957_s14  ;;  %v630_v25 = vld [vmem:[#allocation0 + $0x1f0] ss:$2 sm:%s629_s28]   ;;  %940 = vst.msk [vmem:[%s1513_s1 + $0x77] ss:$8 sm:$0x3] %vm260_vm1, %v636_v24  }
  0x76   :  { %939 = vst.msk [vmem:[%s1513_s1 + $0x76] ss:$8 sm:$0x3] %vm260_vm1, %v630_v25   ;;  %v624_v30 = vld [vmem:[#allocation0 + $0x1e8] ss:$2 sm:%s623_s8]  }
  0x77   :  { %v807_v26 = vld [vmem:[#allocation0 + $0x1c3] ss:$8 sm:$0xf0]   ;;  %v618_v27 = vld [vmem:[#allocation0 + $0x1e0] ss:$2 sm:%s617_s2]   ;;  %s539_s2 = smov 3 }
  0x78   :  { %v612_v28 = vld [vmem:[#allocation0 + $0x1d8] ss:$2 sm:%s611_s5]   ;;  %937 = vst.msk [vmem:[%s1513_s1 + $0x74] ss:$8 sm:$0x3] %vm260_vm1, %v618_v27  }
  0x79   :  { %v606_v29 = vld [vmem:[#allocation0 + $0x1d0] ss:$2 sm:%s605_s30]   ;;  %936 = vst.msk [vmem:[%s1513_s1 + $0x73] ss:$8 sm:$0x3] %vm260_vm1, %v612_v28  }
  0x7a   :  { %v805_v31 = vld [vmem:[#allocation0 + $0x1c3] ss:$8 sm:$0xf]   ;;  %v594_v32 = vld [vmem:[#allocation0 + $0x1c0] ss:$2 sm:%s593_s27]  }
  0x7b   :  { %v809_v34 = vsel %vm644_vm0, %v807_v26, %v805_v31  ;;  %933 = vst.msk [vmem:[%s1513_s1 + $0x70] ss:$8 sm:$0x3] %vm260_vm1, %v594_v32   ;;  %v600_v35 = vld [vmem:[#allocation0 + $0x1c8] ss:$2 sm:%s599_s29]  }
  0x7c   :  { %810 = vrot.lane.b32.xlu0 %v809_v34, %s957_s14  ;;  %934 = vst.msk [vmem:[%s1513_s1 + $0x71] ss:$8 sm:$0x3] %vm260_vm1, %v600_v35   ;;  %v761_v37 = vld [vmem:[#allocation0 + $0x1c1] ss:$8 sm:$0xf]  }
  0x7d   :  { %935 = vst.msk [vmem:[%s1513_s1 + $0x72] ss:$8 sm:$0x3] %vm260_vm1, %v606_v29   ;;  %v763_v38 = vld [vmem:[#allocation0 + $0x1c1] ss:$8 sm:$0xf0]  }
  0x7e   :  { %938 = vst.msk [vmem:[%s1513_s1 + $0x75] ss:$8 sm:$0x3] %vm260_vm1, %v624_v30   ;;  %v765_v39 = vsel %vm644_vm0, %v763_v38, %v761_v37  ;;  %v540_v46 = vld [vmem:[#allocation0 + $0x178] ss:$2 sm:%s539_s2]  }
  0x7f   :  { %766 = vrot.lane.b32.xlu2 %v765_v39, %s957_s14  ;;  %918 = vst.msk [vmem:[%s1513_s1 + $0x51] ss:$8 sm:$0x3] %vm260_vm1, %v504_v33  }
  0x80   :  { %919 = vst.msk [vmem:[%s1513_s1 + $0x52] ss:$8 sm:$0x3] %vm260_vm1, %v510_v36  }
  0x81   :  { %920 = vst.msk [vmem:[%s1513_s1 + $0x53] ss:$8 sm:$0x3] %vm260_vm1, %v516_v40  }
  0x82   :  { %921 = vst.msk [vmem:[%s1513_s1 + $0x54] ss:$8 sm:$0x3] %vm260_vm1, %v522_v42  }
  0x83   :  { %922 = vst.msk [vmem:[%s1513_s1 + $0x55] ss:$8 sm:$0x3] %vm260_vm1, %v528_v41  }
  0x84   :  { %923 = vst.msk [vmem:[%s1513_s1 + $0x56] ss:$8 sm:$0x3] %vm260_vm1, %v534_v43   ;;  %v647_v48 = vpop.permute.xlu0 %646  }
  0x85   :  { %924 = vst.msk [vmem:[%s1513_s1 + $0x57] ss:$8 sm:$0x3] %vm260_vm1, %v540_v46  }
  0x86   :  { %649 = vst.msk [vmem:[%s1513_s1] sm:$0xff] %vm648_vm2, %v647_v48  }
  0x87   :  { %799 = vrot.lane.b32.xlu2 %v798_v47, %s957_s14 }
  0x89   :  { %v690_v50 = vpop.permute.xlu2 %689  }
  0x8a   :  { %944 = vst.msk [vmem:[%s1513_s1 + $0x8] sm:$0xff] %vm648_vm2, %v690_v50  }
  0x8e   :  { %v657_v49 = vpop.permute.xlu0 %656  }
  0x8f   :  { %941 = vst.msk [vmem:[%s1513_s1 + $0x20] sm:$0xff] %vm648_vm2, %v657_v49  }
  0x9e   :  { %v668_v51 = vpop.permute.xlu1 %667  }
  0x9f   :  { %942 = vst.msk [vmem:[%s1513_s1 + $0x40] sm:$0xff] %vm648_vm2, %v668_v51   ;;  %v701_v53 = vpop.permute.xlu2 %700  }
  0xa0   :  { %v712_v52 = vpop.permute.xlu0 %711   ;;  %945 = vst.msk [vmem:[%s1513_s1 + $0x28] sm:$0xff] %vm648_vm2, %v701_v53  }
  0xa1   :  { %946 = vst.msk [vmem:[%s1513_s1 + $0x48] sm:$0xff] %vm648_vm2, %v712_v52  }
  0xb1   :  { %v679_v54 = vpop.permute.xlu1 %678  }
  0xb2   :  { %943 = vst.msk [vmem:[%s1513_s1 + $0x60] sm:$0xff] %vm648_vm2, %v679_v54  }
  0xb9   :  { %v723_v55 = vpop.permute.xlu1 %722  }
  0xba   :  { %947 = vst.msk [vmem:[%s1513_s1 + $0x68] sm:$0xff] %vm648_vm2, %v723_v55  }
  0xbc   :  { %v734_v56 = vpop.permute.xlu2 %733  }
  0xbd   :  { %948 = vst.msk [vmem:[%s1513_s1 + $0x10] sm:$0xff] %vm648_vm2, %v734_v56  }
  0xc0   :  { %v745_v57 = vpop.permute.xlu0 %744  }
  0xc1   :  { %949 = vst.msk [vmem:[%s1513_s1 + $0x30] sm:$0xff] %vm648_vm2, %v745_v57  }
  0xd2   :  { %v778_v58 = vpop.permute.xlu0 %777  }
  0xd3   :  { %952 = vst.msk [vmem:[%s1513_s1 + $0x18] sm:$0xff] %vm648_vm2, %v778_v58  }
  0xd9   :  { %v767_v59 = vpop.permute.xlu2 %766  }
  0xda   :  { %951 = vst.msk [vmem:[%s1513_s1 + $0x70] sm:$0xff] %vm648_vm2, %v767_v59  }
  0xdf   :  { %v756_v60 = vpop.permute.xlu1 %755  }
  0xe0   :  { %950 = vst.msk [vmem:[%s1513_s1 + $0x50] sm:$0xff] %vm648_vm2, %v756_v60  }
  0xe1   :  { %v800_v61 = vpop.permute.xlu2 %799  }
  0xe2   :  { %954 = vst.msk [vmem:[%s1513_s1 + $0x58] sm:$0xff] %vm648_vm2, %v800_v61  }
  0xe7   :  { %v789_v62 = vpop.permute.xlu1 %788  }
  0xe8   :  { %953 = vst.msk [vmem:[%s1513_s1 + $0x38] sm:$0xff] %vm648_vm2, %v789_v62  }
  0xee   :  { %v811_v63 = vpop.permute.xlu0 %810  }
  0xef   :  { %955 = vst.msk [vmem:[%s1513_s1 + $0x78] sm:$0xff] %vm648_vm2, %v811_v63  }

// kernel: attention_network_forward.1
= control target key start
LH: loop header
LB: loop body
LE: loop exit
PB: predicated region body
PF: predicated region fallthrough
CT: control target
= control target key end

     0   :  { %vm195_vm0 = vcmask 1045504   ;;  %vm61_vm1 = vcmask 48128   ;;  %vm240_vm2 = vcmask 523264   ;;  %v1564_v31 = vmov 64.0   ;;  %s2504_s2 = inlined_call_operand.vmem [shape: f32[6,64], index: 2, kind: input, shape index: {}]   ;;  %s2505_s1 = inlined_call_operand.vmem [shape: f32[8,8,6], index: 1, kind: input, shape index: {}]   ;;  %s2506_s3 = inlined_call_operand.vmem [shape: f32[1,64], index: 3, kind: input, shape index: {}]   ;;  %s2507_s4 = inlined_call_operand.vmem [shape: f32[64,16], index: 4, kind: input, shape index: {}]   ;;  %s2508_s6 = inlined_call_operand.vmem [shape: f32[64,256], index: 6, kind: input, shape index: {}]   ;;  %s2509_s5 = inlined_call_operand.vmem [shape: f32[1,16], index: 5, kind: input, shape index: {}]   ;;  %s2510_s8 = inlined_call_operand.vmem [shape: f32[16,256], index: 8, kind: input, shape index: {}]   ;;  %s2511_s9 = inlined_call_operand.vmem [shape: f32[256,256], index: 9, kind: input, shape index: {}]   ;;  %s2512_s7 = inlined_call_operand.vmem [shape: f32[1,256], index: 7, kind: input, shape index: {}]   ;;  %s2513_s12 = inlined_call_operand.vmem [shape: f32[256,64], index: 12, kind: input, shape index: {}]   ;;  %s2514_s11 = inlined_call_operand.vmem [shape: f32[12,64], index: 11, kind: input, shape index: {}]   ;;  %s2515_s10 = inlined_call_operand.vmem [shape: f32[1,256], index: 10, kind: input, shape index: {}]   ;;  %s2516_s0 = inlined_call_operand.vmem [shape: f32[8,12], index: 0, kind: input, shape index: {}]   ;;  %s2517_s13 = inlined_call_operand.vmem [shape: f32[1,64], index: 13, kind: input, shape index: {}]   ;;  %s2518_s15 = inlined_call_operand.vmem [shape: f32[1,64], index: 15, kind: input, shape index: {}]   ;;  %s2519_s14 = inlined_call_operand.vmem [shape: f32[64,64], index: 14, kind: input, shape index: {}]   ;;  %s2520_s16 = inlined_call_operand.vmem [shape: f32[8,64], index: 16, kind: output, shape index: {}]  }
   0x1   :  { %2521 = sst [smem:[#allocation2_spill]] %s2504_s2  ;;  %v1656_v1 = vld [vmem:[%s2505_s1] sm:$0xff]  ;;  %v1663_v2 = vld [vmem:[%s2505_s1 + $0x8] sm:$0xff]  ;;  %v1670_v3 = vld [vmem:[%s2505_s1 + $0x10] sm:$0xff]  ;;  %1510 = vrcp.f32 %v1564_v31 }
   0x2   :  { %s2522_s23 = sld [smem:[#allocation2_spill]]  ;;  %v1677_v4 = vld [vmem:[%s2505_s1 + $0x18] sm:$0xff]  ;;  %v1684_v5 = vld [vmem:[%s2505_s1 + $0x20] sm:$0xff]  ;;  %v1691_v6 = vld [vmem:[%s2505_s1 + $0x28] sm:$0xff] }
   0x3   :  { %v1698_v7 = vld [vmem:[%s2505_s1 + $0x30] sm:$0xff]  ;;  %v1705_v8 = vld [vmem:[%s2505_s1 + $0x38] sm:$0xff]  ;;  %v1506_v9 = vld [vmem:[%s2506_s3] ss:$0 sm:$0xff] }
   0x4   :  { %v792_v31 = vld [vmem:[%s2508_s6 + $0x20] sm:$0xff] }
   0x7   :  { %v1511_v32 = vpop.eup %1510 }
   0x8   :  { %v166_v0 = vld [vmem:[%s2522_s23] sm:$0x3f]  ;;  %v266_v33 = vmul.f32 64.0, %v1511_v32  ;;  %vm270_vm3 = vweird.f32 %v1511_v32 }
   0x9   :  { %1453 = vmatpush.msk.msra.mxu0 %vm195_vm0, %v166_v0 }
   0xa   :  { %1454 = vmatmul.msk.f32.vlgmr.msra.gmra.mxu0 %vm61_vm1, %v1656_v1  ;;  %v267_v34 = vsub.f32 1.0, %v266_v33  ;;  %v790_v33 = vld [vmem:[%s2508_s6 + $0x10] sm:$0xff] }
   0xc   :  { %v268_v35 = vmul.f32 %v1511_v32, %v267_v34  ;;  %v424_v34 = vld [vmem:[%s2507_s4] sm:$0xff] }
   0xe   :  { %v269_v36 = vadd.f32 %v1511_v32, %v268_v35  ;;  %v788_v35 = vld [vmem:[%s2508_s6] sm:$0xff] }
  0x10   :  { %v1719_v37 = vsel %vm270_vm3, %v1511_v32, %v269_v36  ;;  %v425_v32 = vld [vmem:[%s2507_s4 + $0x8] sm:$0xff] }
  0x12   :  { %1455 = vmatmul.msk.f32.gmra.mxu0 %vm61_vm1, %v1663_v2 }
  0x1a   :  { %1456 = vmatmul.msk.f32.gmra.mxu0 %vm61_vm1, %v1670_v3 }
  0x22   :  { %1457 = vmatmul.msk.f32.gmra.mxu0 %vm61_vm1, %v1677_v4 }
  0x2a   :  { %1458 = vmatmul.msk.f32.gmra.mxu0 %vm61_vm1, %v1684_v5 }
  0x32   :  { %1459 = vmatmul.msk.f32.gmra.mxu0 %vm61_vm1, %v1691_v6 }
  0x3a   :  { %1460 = vmatmul.msk.f32.gmra.mxu0 %vm61_vm1, %v1698_v7 }
  0x42   :  { %1461 = vmatmul.msk.f32.gmra.mxu0 %vm61_vm1, %v1705_v8 }
  0x87   :  { %v216_v10 = vpop.f32.mrf.mxu0 }
  0x88   :  { %v217_v11 = vadd.f32 %v1506_v9, %v216_v10 }
  0x8a   :  { %v241_v12 = vsel %vm240_vm2, %v217_v11, 0.0 }
  0x8b   :  { %242 = vadd.xlane.f32.xlu0 %v241_v12 }
  0x8f   :  { %v219_v13 = vpop.f32.mrf.mxu0 }
  0x90   :  { %v220_v14 = vadd.f32 %v1506_v9, %v219_v13 }
  0x92   :  { %v244_v15 = vsel %vm240_vm2, %v220_v14, 0.0 }
  0x93   :  { %245 = vadd.xlane.f32.xlu0 %v244_v15 }
  0x97   :  { %v222_v16 = vpop.f32.mrf.mxu0 }
  0x98   :  { %v223_v17 = vadd.f32 %v1506_v9, %v222_v16 }
  0x9a   :  { %v247_v18 = vsel %vm240_vm2, %v223_v17, 0.0 }
  0x9b   :  { %248 = vadd.xlane.f32.xlu1 %v247_v18 }
  0x9f   :  { %v225_v19 = vpop.f32.mrf.mxu0 }
  0xa0   :  { %v226_v20 = vadd.f32 %v1506_v9, %v225_v19 }
  0xa2   :  { %v250_v21 = vsel %vm240_vm2, %v226_v20, 0.0 }
  0xa3   :  { %251 = vadd.xlane.f32.xlu1 %v250_v21  ;;  %v802_v21 = vld [vmem:[%s2508_s6 + $0x70] sm:$0xff] }
  0xa4   :  { %818 = vmatpush.msrb.mxu0 %v802_v21 }
  0xa7   :  { %v228_v22 = vpop.f32.mrf.mxu0 }
  0xa8   :  { %v229_v23 = vadd.f32 %v1506_v9, %v228_v22  ;;  %v430_v22 = vld [vmem:[%s2507_s4 + $0x30] sm:$0xff] }
  0xaa   :  { %v253_v24 = vsel %vm240_vm2, %v229_v23, 0.0 }
  0xab   :  { %254 = vadd.xlane.f32.xlu2 %v253_v24  ;;  %v429_v24 = vld [vmem:[%s2507_s4 + $0x28] sm:$0xff] }
  0xaf   :  { %v231_v25 = vpop.f32.mrf.mxu0 }
  0xb0   :  { %v232_v26 = vadd.f32 %v1506_v9, %v231_v25  ;;  %v798_v25 = vld [vmem:[%s2508_s6 + $0x50] sm:$0xff] }
  0xb2   :  { %v256_v27 = vsel %vm240_vm2, %v232_v26, 0.0 }
  0xb3   :  { %257 = vadd.xlane.f32.xlu2 %v256_v27  ;;  %v796_v27 = vld [vmem:[%s2508_s6 + $0x40] sm:$0xff] }
  0xb7   :  { %v234_v28 = vpop.f32.mrf.mxu0 }
  0xb8   :  { %v235_v29 = vadd.f32 %v1506_v9, %v234_v28  ;;  %v427_v28 = vld [vmem:[%s2507_s4 + $0x18] sm:$0xff] }
  0xba   :  { %v259_v30 = vsel %vm240_vm2, %v235_v29, 0.0 }
  0xbb   :  { %260 = vadd.xlane.f32.xlu1 %v259_v30  ;;  %v426_v30 = vld [vmem:[%s2507_s4 + $0x10] sm:$0xff] }
  0xbf   :  { %v237_v42 = vpop.f32.mrf.mxu0 }
  0xc0   :  { %v1728_v46 = vadd.f32 %v1506_v9, %v237_v42 }
  0xc2   :  { %v262_v48 = vsel %vm240_vm2, %v1728_v46, 0.0 }
  0xfe   :  { %v243_v38 = vpop.xlane.xlu0 %242 }
  0xff   :  { %v272_v39 = vmul.f32 %v1719_v37, %v243_v38 }
 0x101   :  { %v1722_v40 = vsub.f32 %v217_v11, %v272_v39  ;;  %v62_v39 = vsel %vm61_vm1, %v1656_v1, 0.0 }
 0x103   :  { %v288_v41 = vmul.f32 %v1722_v40, %v1722_v40 }
 0x105   :  { %v296_v43 = vsel %vm240_vm2, %v288_v41, 0.0 }
 0x106   :  { %297 = vadd.xlane.f32.xlu0 %v296_v43  ;;  %v246_v44 = vpop.xlane.xlu0 %245 }
 0x107   :  { %v273_v45 = vmul.f32 %v1719_v37, %v246_v44 }
 0x109   :  { %v1730_v47 = vsub.f32 %v220_v14, %v273_v45 }
 0x10b   :  { %v289_v49 = vmul.f32 %v1730_v47, %v1730_v47 }
 0x10d   :  { %v299_v50 = vsel %vm240_vm2, %v289_v49, 0.0 }
 0x10e   :  { %v249_v51 = vpop.xlane.xlu1 %248  ;;  %263 = vadd.xlane.f32.xlu0 %v262_v48  ;;  %300 = vadd.xlane.f32.xlu2 %v299_v50  ;;  %v65_v48 = vsel %vm61_vm1, %v1663_v2, 0.0 }
 0x10f   :  { %v274_v52 = vmul.f32 %v1719_v37, %v249_v51 }
 0x111   :  { %v1738_v53 = vsub.f32 %v223_v17, %v274_v52 }
 0x113   :  { %v290_v54 = vmul.f32 %v1738_v53, %v1738_v53 }
 0x115   :  { %v302_v55 = vsel %vm240_vm2, %v290_v54, 0.0 }
 0x116   :  { %303 = vadd.xlane.f32.xlu1 %v302_v55  ;;  %v252_v56 = vpop.xlane.xlu1 %251 }
 0x117   :  { %v275_v57 = vmul.f32 %v1719_v37, %v252_v56 }
 0x119   :  { %v1744_v58 = vsub.f32 %v226_v20, %v275_v57  ;;  %v431_v20 = vld [vmem:[%s2507_s4 + $0x38] sm:$0xff] }
 0x11a   :  { %468 = vmatpush.msra.mxu1 %v431_v20 }
 0x11b   :  { %v291_v59 = vmul.f32 %v1744_v58, %v1744_v58 }
 0x11c   :  { %469 = vmatpush.msra.mxu1 %v430_v22 }
 0x11d   :  { %v305_v60 = vsel %vm240_vm2, %v291_v59, 0.0 }
 0x11e   :  { %v255_v61 = vpop.xlane.xlu2 %254  ;;  %306 = vadd.xlane.f32.xlu2 %v305_v60  ;;  %470 = vmatpush.msra.mxu1 %v429_v24 }
 0x11f   :  { %v276_v62 = vmul.f32 %v1719_v37, %v255_v61 }
 0x121   :  { %v1750_v63 = vsub.f32 %v229_v23, %v276_v62  ;;  %v800_v23 = vld [vmem:[%s2508_s6 + $0x60] sm:$0xff] }
 0x122   :  { %819 = vmatpush.msrb.mxu0 %v800_v23 }
 0x123   :  { %v292_v0 = vmul.f32 %v1750_v63, %v1750_v63 }
 0x124   :  { %820 = vmatpush.msrb.mxu0 %v798_v25 }
 0x125   :  { %v308_v9 = vsel %vm240_vm2, %v292_v0, 0.0  ;;  %v68_v0 = vsel %vm61_vm1, %v1670_v3, 0.0 }
 0x126   :  { %v258_v10 = vpop.xlane.xlu2 %257  ;;  %309 = vadd.xlane.f32.xlu0 %v308_v9  ;;  %821 = vmatpush.msrb.mxu0 %v796_v27 }
 0x127   :  { %v277_v11 = vmul.f32 %v1719_v37, %v258_v10 }
 0x129   :  { %v1756_v12 = vsub.f32 %v232_v26, %v277_v11  ;;  %v428_v26 = vld [vmem:[%s2507_s4 + $0x20] sm:$0xff] }
 0x12a   :  { %471 = vmatpush.msra.mxu1 %v428_v26 }
 0x12b   :  { %v293_v13 = vmul.f32 %v1756_v12, %v1756_v12 }
 0x12c   :  { %472 = vmatpush.msra.mxu1 %v427_v28 }
 0x12d   :  { %v311_v14 = vsel %vm240_vm2, %v293_v13, 0.0 }
 0x12e   :  { %312 = vadd.xlane.f32.xlu1 %v311_v14  ;;  %v261_v15 = vpop.xlane.xlu1 %260  ;;  %473 = vmatpush.msra.mxu1 %v426_v30 }
 0x12f   :  { %v278_v16 = vmul.f32 %v1719_v37, %v261_v15 }
 0x130   :  { %474 = vmatpush.msra.mxu1 %v425_v32 }
 0x131   :  { %v1762_v17 = vsub.f32 %v235_v29, %v278_v16  ;;  %v794_v29 = vld [vmem:[%s2508_s6 + $0x30] sm:$0xff]  ;;  %v71_v16 = vsel %vm61_vm1, %v1677_v4, 0.0  ;;  %v74_v4 = vsel %vm61_vm1, %v1684_v5, 0.0  ;;  %v77_v5 = vsel %vm61_vm1, %v1691_v6, 0.0 }
 0x132   :  { %822 = vmatpush.msrb.mxu0 %v794_v29  ;;  %475 = vmatpush.msra.mxu1 %v424_v34 }
 0x133   :  { %v294_v18 = vmul.f32 %v1762_v17, %v1762_v17 }
 0x134   :  { %823 = vmatpush.msrb.mxu0 %v792_v31 }
 0x135   :  { %v314_v19 = vsel %vm240_vm2, %v294_v18, 0.0 }
 0x136   :  { %315 = vadd.xlane.f32.xlu2 %v314_v19  ;;  %824 = vmatpush.msrb.mxu0 %v790_v33 }
 0x137   :  { %63 = vadd.xlane.f32.xlu1 %v62_v39 }
 0x138   :  { %825 = vmatpush.msrb.mxu0 %v788_v35 }
 0x13e   :  { %66 = vadd.xlane.f32.xlu2 %v65_v48 }
 0x13f   :  { %72 = vadd.xlane.f32.xlu1 %v71_v16 }
 0x146   :  { %75 = vadd.xlane.f32.xlu2 %v74_v4 }
 0x179   :  { %v298_v36 = vpop.xlane.xlu0 %297 }
 0x17a   :  { %v320_v38 = vmul.f32 %v298_v36, %v1719_v37 }
 0x17c   :  { %v328_v41 = vadd.f32 1e-05, %v320_v38  ;;  %v80_v38 = vsel %vm61_vm1, %v1698_v7, 0.0 }
 0x17d   :  { %81 = vadd.xlane.f32.xlu1 %v80_v38 }
 0x17e   :  { %1512 = vrsqrt.f32 %v328_v41  ;;  %vm342_vm5 = vweird.f32 %v328_v41 }
 0x181   :  { %v301_v42 = vpop.xlane.xlu2 %300  ;;  %v264_v43 = vpop.xlane.xlu0 %263 }
 0x182   :  { %v321_v44 = vmul.f32 %v301_v42, %v1719_v37  ;;  %v279_v45 = vmul.f32 %v1719_v37, %v264_v43 }
 0x184   :  { %v1513_v49 = vpop.eup %1512  ;;  %v329_v50 = vadd.f32 1e-05, %v321_v44  ;;  %v1823_v51 = vsub.f32 %v1728_v46, %v279_v45 }
 0x185   :  { %v337_v52 = vmul.f32 %v1513_v49, %v328_v41  ;;  %vm343_vm4 = vweird.f32 %v1513_v49 }
 0x186   :  { %1514 = vrsqrt.f32 %v329_v50  ;;  %v295_v1 = vmul.f32 %v1823_v51, %v1823_v51  ;;  %vm344_vm6 = vmor %vm342_vm5, %vm343_vm4  ;;  %vm352_vm8 = vweird.f32 %v329_v50 }
 0x187   :  { %v338_v54 = vmul.f32 %v1513_v49, %v337_v52 }
 0x188   :  { %v317_v55 = vsel %vm240_vm2, %v295_v1, 0.0 }
 0x189   :  { %v339_v56 = vmul.f32 0.5, %v338_v54  ;;  %v304_v57 = vpop.xlane.xlu1 %303  ;;  %318 = vadd.xlane.f32.xlu0 %v317_v55 }
 0x18a   :  { %v322_v59 = vmul.f32 %v304_v57, %v1719_v37 }
 0x18b   :  { %v340_v2 = vsub.f32 1.5, %v339_v56 }
 0x18c   :  { %v1515_v60 = vpop.eup %1514  ;;  %v330_v61 = vadd.f32 1e-05, %v322_v59 }
 0x18d   :  { %v347_v46 = vmul.f32 %v1515_v60, %v329_v50  ;;  %v341_v62 = vmul.f32 %v1513_v49, %v340_v2  ;;  %vm353_vm7 = vweird.f32 %v1515_v60 }
 0x18e   :  { %1516 = vrsqrt.f32 %v330_v61  ;;  %vm354_vm9 = vmor %vm352_vm8, %vm353_vm7  ;;  %vm362_vm11 = vweird.f32 %v330_v61 }
 0x18f   :  { %v348_v9 = vmul.f32 %v1515_v60, %v347_v46  ;;  %v345_v10 = vsel %vm344_vm6, %v1513_v49, %v341_v62 }
 0x190   :  { %v1832_v11 = vmul.f32 %v345_v10, %v1722_v40 }
 0x191   :  { %v349_v13 = vmul.f32 0.5, %v348_v9  ;;  %v307_v14 = vpop.xlane.xlu2 %306  ;;  %69 = vadd.xlane.f32.xlu0 %v68_v0 }
 0x192   :  { %v323_v15 = vmul.f32 %v307_v14, %v1719_v37  ;;  %1462 = vmatmul.msk.f32.vlgmr.msra.gmra.mxu1 %vm240_vm2, %v1832_v11  ;;  %1486 = vmatmul.msk.f32.vlgmr.msrb.gmra.mxu0 %vm240_vm2, %v1832_v11 }
 0x193   :  { %v350_v3 = vsub.f32 1.5, %v349_v13 }
 0x194   :  { %v1517_v18 = vpop.eup %1516  ;;  %v331_v40 = vadd.f32 1e-05, %v323_v15 }
 0x195   :  { %v357_v19 = vmul.f32 %v1517_v18, %v330_v61  ;;  %v351_v20 = vmul.f32 %v1515_v60, %v350_v3  ;;  %vm363_vm10 = vweird.f32 %v1517_v18 }
 0x196   :  { %1518 = vrsqrt.f32 %v331_v40  ;;  %vm364_vm12 = vmor %vm362_vm11, %vm363_vm10  ;;  %vm372_vm14 = vweird.f32 %v331_v40 }
 0x197   :  { %v358_v21 = vmul.f32 %v1517_v18, %v357_v19  ;;  %v355_v22 = vsel %vm354_vm9, %v1515_v60, %v351_v20 }
 0x198   :  { %v1842_v23 = vmul.f32 %v355_v22, %v1730_v47 }
 0x199   :  { %v359_v24 = vmul.f32 0.5, %v358_v21  ;;  %v310_v25 = vpop.xlane.xlu0 %309  ;;  %78 = vadd.xlane.f32.xlu0 %v77_v5 }
 0x19a   :  { %v324_v26 = vmul.f32 %v310_v25, %v1719_v37  ;;  %1463 = vmatmul.msk.f32.gmra.mxu1 %vm240_vm2, %v1842_v23  ;;  %1487 = vmatmul.msk.f32.gmra.mxu0 %vm240_vm2, %v1842_v23 }
 0x19b   :  { %v360_v27 = vsub.f32 1.5, %v359_v24  ;;  %v1901_v24 = vld [vmem:[%s2509_s5] ss:$0 sm:$0xff] }
 0x19c   :  { %v1519_v28 = vpop.eup %1518  ;;  %v332_v29 = vadd.f32 1e-05, %v324_v26 }
 0x19d   :  { %v367_v47 = vmul.f32 %v1519_v28, %v331_v40  ;;  %v361_v30 = vmul.f32 %v1517_v18, %v360_v27  ;;  %vm373_vm13 = vweird.f32 %v1519_v28 }
 0x19e   :  { %1520 = vrsqrt.f32 %v332_v29  ;;  %vm374_vm15 = vmor %vm372_vm14, %vm373_vm13  ;;  %vm382_vm3 = vweird.f32 %v332_v29  ;;  %vm525_vm13 = vcmask 130048  }
 0x19f   :  { %v368_v31 = vmul.f32 %v1519_v28, %v367_v47  ;;  %v365_v32 = vsel %vm364_vm12, %v1517_v18, %v361_v30 }
 0x1a0   :  { %v1852_v33 = vmul.f32 %v365_v32, %v1738_v53 }
 0x1a1   :  { %v369_v34 = vmul.f32 0.5, %v368_v31  ;;  %v313_v35 = vpop.xlane.xlu1 %312 }
 0x1a2   :  { %v325_v36 = vmul.f32 %v313_v35, %v1719_v37  ;;  %1464 = vmatmul.msk.f32.gmra.mxu1 %vm240_vm2, %v1852_v33  ;;  %1488 = vmatmul.msk.f32.gmra.mxu0 %vm240_vm2, %v1852_v33 }
 0x1a3   :  { %v370_v39 = vsub.f32 1.5, %v369_v34 }
 0x1a4   :  { %v1521_v53 = vpop.eup %1520  ;;  %v333_v41 = vadd.f32 1e-05, %v325_v36 }
 0x1a5   :  { %v377_v42 = vmul.f32 %v1521_v53, %v332_v29  ;;  %v371_v43 = vmul.f32 %v1519_v28, %v370_v39  ;;  %vm383_vm0 = vweird.f32 %v1521_v53 }
 0x1a6   :  { %1522 = vrsqrt.f32 %v333_v41  ;;  %vm384_vm4 = vmor %vm382_vm3, %vm383_vm0  ;;  %vm392_vm6 = vweird.f32 %v333_v41 }
 0x1a7   :  { %v378_v44 = vmul.f32 %v1521_v53, %v377_v42  ;;  %v375_v45 = vsel %vm374_vm15, %v1519_v28, %v371_v43 }
 0x1a8   :  { %v1864_v48 = vmul.f32 %v375_v45, %v1744_v58  ;;  %v680_v45 = vld [vmem:[%s2510_s8 + $0x10] sm:$0xff] }
 0x1a9   :  { %v379_v6 = vmul.f32 0.5, %v378_v44  ;;  %v316_v49 = vpop.xlane.xlu2 %315  ;;  %720 = vmatpush.msra.mxu2 %v680_v45 }
 0x1aa   :  { %v326_v7 = vmul.f32 %v316_v49, %v1719_v37  ;;  %1465 = vmatmul.msk.f32.gmra.mxu1 %vm240_vm2, %v1864_v48  ;;  %1489 = vmatmul.msk.f32.gmra.mxu0 %vm240_vm2, %v1864_v48  ;;  %v1895_v20 = vpop.xlane.xlu1 %63 }
 0x1ab   :  { %v380_v50 = vsub.f32 1.5, %v379_v6  ;;  %v86_v21 = vand.u32 2147483647, %v1895_v20  ;;  %v681_v6 = vld [vmem:[%s2510_s8 + $0x18] sm:$0xff] }
 0x1ac   :  { %v1523_v52 = vpop.eup %1522  ;;  %v334_v1 = vadd.f32 1e-05, %v326_v7  ;;  %761 = vmatpush.msra.mxu3 %v681_v6 }
 0x1ad   :  { %v387_v54 = vmul.f32 %v1523_v52, %v333_v41  ;;  %v381_v55 = vmul.f32 %v1521_v53, %v380_v50  ;;  %vm393_vm5 = vweird.f32 %v1523_v52  ;;  %vm94_vm11 = vcmp.eq.f32.partialorder %v86_v21, 0.0 }
 0x1ae   :  { %1524 = vrsqrt.f32 %v334_v1  ;;  %vm394_vm7 = vmor %vm392_vm6, %vm393_vm5  ;;  %vm402_vm9 = vweird.f32 %v334_v1 }
 0x1af   :  { %v388_v58 = vmul.f32 %v1523_v52, %v387_v54  ;;  %v385_v56 = vsel %vm384_vm4, %v1521_v53, %v381_v55  ;;  %v678_v54 = vld [vmem:[%s2510_s8] sm:$0xff]  ;;  %v679_v55 = vld [vmem:[%s2510_s8 + $0x8] sm:$0xff] }
 0x1b0   :  { %v1872_v57 = vmul.f32 %v385_v56, %v1750_v63  ;;  %721 = vmatpush.msra.mxu2 %v678_v54  ;;  %762 = vmatpush.msra.mxu3 %v679_v55 }
 0x1b1   :  { %v389_v59 = vmul.f32 0.5, %v388_v58  ;;  %v1904_v4 = vpop.xlane.xlu2 %66 }
 0x1b2   :  { %1466 = vmatmul.msk.f32.gmra.mxu1 %vm240_vm2, %v1872_v57  ;;  %1490 = vmatmul.msk.f32.gmra.mxu0 %vm240_vm2, %v1872_v57  ;;  %v87_v30 = vand.u32 2147483647, %v1904_v4 }
 0x1b3   :  { %v390_v2 = vsub.f32 1.5, %v389_v59 }
 0x1b4   :  { %v1525_v60 = vpop.eup %1524  ;;  %vm95_vm15 = vcmp.eq.f32.partialorder %v87_v30, 0.0 }
 0x1b5   :  { %v397_v61 = vmul.f32 %v1525_v60, %v334_v1  ;;  %v391_v46 = vmul.f32 %v1523_v52, %v390_v2  ;;  %vm403_vm8 = vweird.f32 %v1525_v60  ;;  %v1927_v1 = vpop.xlane.xlu1 %72 }
 0x1b6   :  { %vm404_vm10 = vmor %vm402_vm9, %vm403_vm8  ;;  %vm1090_vm8 = vcmask 1041409   ;;  %vm1092_vm9 = vcmask 1042434  }
 0x1b7   :  { %v398_v62 = vmul.f32 %v1525_v60, %v397_v61  ;;  %v395_v0 = vsel %vm394_vm7, %v1523_v52, %v391_v46 }
 0x1b8   :  { %v1879_v9 = vmul.f32 %v395_v0, %v1756_v12  ;;  %v83_v12 = vsel %vm61_vm1, %v1705_v8, 0.0 }
 0x1b9   :  { %v399_v63 = vmul.f32 0.5, %v398_v62  ;;  %84 = vadd.xlane.f32.xlu2 %v83_v12  ;;  %v1938_v12 = vpop.xlane.xlu2 %75 }
 0x1ba   :  { %1467 = vmatmul.msk.f32.gmra.mxu1 %vm240_vm2, %v1879_v9  ;;  %1491 = vmatmul.msk.f32.gmra.mxu0 %vm240_vm2, %v1879_v9  ;;  %v90_v21 = vand.u32 2147483647, %v1938_v12 }
 0x1bb   :  { %v400_v10 = vsub.f32 1.5, %v399_v63 }
 0x1bc   :  { %vm98_vm4 = vcmp.eq.f32.partialorder %v90_v21, 0.0 }
 0x1bd   :  { %v401_v13 = vmul.f32 %v1525_v60, %v400_v10 }
 0x1bf   :  { %v405_v14 = vsel %vm404_vm10, %v1525_v60, %v401_v13  ;;  %v89_v60 = vand.u32 2147483647, %v1927_v1  ;;  %vm1094_vm10 = vcmask 1043459  }
 0x1c0   :  { %v1886_v15 = vmul.f32 %v405_v14, %v1762_v17 }
 0x1c1   :  { %vm97_vm3 = vcmp.eq.f32.partialorder %v89_v60, 0.0 }
 0x1c2   :  { %1468 = vmatmul.msk.f32.gmra.mxu1 %vm240_vm2, %v1886_v15  ;;  %1492 = vmatmul.msk.f32.gmra.mxu0 %vm240_vm2, %v1886_v15 }
 0x1fc   :  { %v319_v16 = vpop.xlane.xlu0 %318 }
 0x1fd   :  { %v327_v3 = vmul.f32 %v319_v16, %v1719_v37 }
 0x1ff   :  { %v335_v18 = vadd.f32 1e-05, %v327_v3 }
 0x201   :  { %1526 = vrsqrt.f32 %v335_v18  ;;  %vm412_vm12 = vweird.f32 %v335_v18 }
 0x204   :  { %v1916_v5 = vpop.xlane.xlu0 %69 }
 0x205   :  { %v88_v53 = vand.u32 2147483647, %v1916_v5 }
 0x207   :  { %v1527_v40 = vpop.eup %1526  ;;  %vm96_vm0 = vcmp.eq.f32.partialorder %v88_v53, 0.0 }
 0x208   :  { %v407_v19 = vmul.f32 %v1527_v40, %v335_v18  ;;  %vm413_vm1 = vweird.f32 %v1527_v40 }
 0x209   :  { %vm414_vm14 = vmor %vm412_vm12, %vm413_vm1  ;;  %vm1096_vm1 = vcmask 1044484   ;;  %vm1100_vm12 = vcmask 1046534  }
 0x20a   :  { %v408_v17 = vmul.f32 %v1527_v40, %v407_v19 }
 0x20c   :  { %v409_v22 = vmul.f32 0.5, %v408_v17 }
 0x20e   :  { %v410_v8 = vsub.f32 1.5, %v409_v22 }
 0x20f   :  { %v477_v25 = vpop.f32.mrf.mxu1 }
 0x210   :  { %v478_v37 = vadd.f32 %v1901_v24, %v477_v25  ;;  %v411_v26 = vmul.f32 %v1527_v40, %v410_v8 }
 0x212   :  { %v517_v27 = vsel %vm94_vm11, -1e+30, %v478_v37  ;;  %v415_v28 = vsel %vm414_vm14, %v1527_v40, %v411_v26  ;;  %vm1098_vm11 = vcmask 1045509   ;;  %vm1382_vm14 = vcmask 1043456  }
 0x213   :  { %v526_v29 = vsel %vm525_vm13, %v517_v27, -inf  ;;  %v1908_v47 = vmul.f32 %v415_v28, %v1823_v51 }
 0x214   :  { %v527_v31 = vrot.slane %v526_v29, 4 }
 0x215   :  { %1469 = vmatmul.msk.f32.gmra.mxu1 %vm240_vm2, %v1908_v47  ;;  %1493 = vmatmul.msk.f32.gmra.mxu0 %vm240_vm2, %v1908_v47 }
 0x216   :  { %v528_v32 = vmax.f32 %v526_v29, %v527_v31 }
 0x217   :  { %v480_v34 = vpop.f32.mrf.mxu1 }
 0x218   :  { %v529_v35 = vrot.slane %v528_v32, 2  ;;  %v481_v36 = vadd.f32 %v1901_v24, %v480_v34  ;;  %v1947_v34 = vpop.xlane.xlu0 %78 }
 0x21a   :  { %v530_v38 = vmax.f32 %v528_v32, %v529_v35  ;;  %v518_v51 = vsel %vm95_vm15, -1e+30, %v481_v36  ;;  %vm1378_vm15 = vcmask 97280  }
 0x21b   :  { %v533_v39 = vsel %vm525_vm13, %v518_v51, -inf }
 0x21c   :  { %v531_v41 = vrot.slane %v530_v38, 1  ;;  %v534_v42 = vrot.slane %v533_v39, 4 }
 0x21e   :  { %v532_v43 = vmax.f32 %v530_v38, %v531_v41  ;;  %v535_v44 = vmax.f32 %v533_v39, %v534_v42  ;;  %v91_v42 = vand.u32 2147483647, %v1947_v34 }
 0x21f   :  { %v483_v49 = vpop.f32.mrf.mxu1 }
 0x220   :  { %v582_v7 = vsub.f32 %v517_v27, %v532_v43  ;;  %v536_v50 = vrot.slane %v535_v44, 2  ;;  %v484_v52 = vadd.f32 %v1901_v24, %v483_v49  ;;  %vm99_vm5 = vcmp.eq.f32.partialorder %v91_v42, 0.0 }
 0x222   :  { %v590_v58 = vmul.f32 1.442695, %v582_v7  ;;  %v537_v56 = vmax.f32 %v535_v44, %v536_v50  ;;  %v519_v59 = vsel %vm96_vm0, -1e+30, %v484_v52 }
 0x223   :  { %v540_v2 = vsel %vm525_vm13, %v519_v59, -inf }
 0x224   :  { %1528 = vpow2.f32 %v590_v58  ;;  %v538_v61 = vrot.slane %v537_v56, 1  ;;  %v541_v46 = vrot.slane %v540_v2, 4 }
 0x226   :  { %v539_v62 = vmax.f32 %v537_v56, %v538_v61  ;;  %v542_v0 = vmax.f32 %v540_v2, %v541_v46  ;;  %v1956_v2 = vpop.xlane.xlu1 %81 }
 0x227   :  { %v486_v63 = vpop.f32.mrf.mxu1 }
 0x228   :  { %v583_v10 = vsub.f32 %v518_v51, %v539_v62  ;;  %v543_v13 = vrot.slane %v542_v0, 2  ;;  %v487_v14 = vadd.f32 %v1901_v24, %v486_v63 }
 0x22a   :  { %v1940_v16 = vpop.eup %1528  ;;  %v592_v3 = vmul.f32 1.442695, %v583_v10  ;;  %v544_v18 = vmax.f32 %v542_v0, %v543_v13  ;;  %v520_v40 = vsel %vm97_vm3, -1e+30, %v487_v14  ;;  %v92_v13 = vand.u32 2147483647, %v1956_v2 }
 0x22b   :  { %v606_v19 = vsel %vm525_vm13, %v1940_v16, 0.0  ;;  %v547_v17 = vsel %vm525_vm13, %v520_v40, -inf }
 0x22c   :  { %v607_v22 = vrot.slane %v606_v19, 4  ;;  %1530 = vpow2.f32 %v592_v3  ;;  %v545_v8 = vrot.slane %v544_v18, 1  ;;  %v548_v25 = vrot.slane %v547_v17, 4 }
 0x22d   :  { %vm100_vm6 = vcmp.eq.f32.partialorder %v92_v13, 0.0 }
 0x22e   :  { %v608_v37 = vadd.f32 %v607_v22, %v606_v19  ;;  %v546_v26 = vmax.f32 %v544_v18, %v545_v8  ;;  %v549_v27 = vmax.f32 %v547_v17, %v548_v25 }
 0x22f   :  { %v489_v28 = vpop.f32.mrf.mxu1 }
 0x230   :  { %v609_v29 = vrot.slane %v608_v37, 2  ;;  %v584_v30 = vsub.f32 %v519_v59, %v546_v26  ;;  %v550_v31 = vrot.slane %v549_v27, 2  ;;  %v490_v32 = vadd.f32 %v1901_v24, %v489_v28 }
 0x232   :  { %v1949_v35 = vpop.eup %1530  ;;  %v594_v36 = vmul.f32 1.442695, %v584_v30  ;;  %v551_v38 = vmax.f32 %v549_v27, %v550_v31  ;;  %v521_v51 = vsel %vm98_vm4, -1e+30, %v490_v32  ;;  %v610_v39 = vadd.f32 %v609_v29, %v608_v37 }
 0x233   :  { %v613_v53 = vsel %vm525_vm13, %v1949_v35, 0.0  ;;  %v554_v41 = vsel %vm525_vm13, %v521_v51, -inf }
 0x234   :  { %v614_v43 = vrot.slane %v613_v53, 4  ;;  %1532 = vpow2.f32 %v594_v36  ;;  %v552_v44 = vrot.slane %v551_v38, 1  ;;  %v555_v45 = vrot.slane %v554_v41, 4 }
 0x235   :  { %v611_v6 = vrot.slane %v610_v39, 1 }
 0x236   :  { %v615_v49 = vadd.f32 %v614_v43, %v613_v53  ;;  %v553_v7 = vmax.f32 %v551_v38, %v552_v44  ;;  %v556_v50 = vmax.f32 %v554_v41, %v555_v45 }
 0x237   :  { %v492_v52 = vpop.f32.mrf.mxu1  ;;  %v612_v54 = vadd.f32 %v611_v6, %v610_v39 }
 0x238   :  { %v616_v55 = vrot.slane %v615_v49, 2  ;;  %v585_v58 = vsub.f32 %v520_v40, %v553_v7  ;;  %v557_v56 = vrot.slane %v556_v50, 2  ;;  %v493_v59 = vadd.f32 %v1901_v24, %v492_v52 }
 0x239   :  { %1534 = vrcp.f32 %v612_v54 }
 0x23a   :  { %v1958_v60 = vpop.eup %1532  ;;  %v596_v61 = vmul.f32 1.442695, %v585_v58  ;;  %v558_v46 = vmax.f32 %v556_v50, %v557_v56  ;;  %v522_v62 = vsel %vm99_vm5, -1e+30, %v493_v59  ;;  %v617_v0 = vadd.f32 %v616_v55, %v615_v49 }
 0x23b   :  { %v620_v63 = vsel %vm525_vm13, %v1958_v60, 0.0  ;;  %v561_v10 = vsel %vm525_vm13, %v522_v62, -inf }
 0x23c   :  { %v621_v14 = vrot.slane %v620_v63, 4  ;;  %1536 = vpow2.f32 %v596_v61  ;;  %v559_v3 = vrot.slane %v558_v46, 1  ;;  %v562_v18 = vrot.slane %v561_v10, 4 }
 0x23d   :  { %v618_v40 = vrot.slane %v617_v0, 1 }
 0x23e   :  { %v622_v19 = vadd.f32 %v621_v14, %v620_v63  ;;  %v560_v17 = vmax.f32 %v558_v46, %v559_v3  ;;  %v563_v21 = vmax.f32 %v561_v10, %v562_v18 }
 0x23f   :  { %v1535_v22 = vpop.eup %1534  ;;  %v495_v8 = vpop.f32.mrf.mxu1  ;;  %v619_v25 = vadd.f32 %v618_v40, %v617_v0 }
 0x240   :  { %v623_v37 = vrot.slane %v622_v19, 2  ;;  %v586_v26 = vsub.f32 %v521_v51, %v560_v17  ;;  %v564_v27 = vrot.slane %v563_v21, 2  ;;  %v496_v28 = vadd.f32 %v1901_v24, %v495_v8 }
 0x241   :  { %v670_v29 = vmul.f32 %v1535_v22, %v1940_v16  ;;  %1538 = vrcp.f32 %v619_v25 }
 0x242   :  { %v1537_v30 = vpop.eup %1536  ;;  %v598_v31 = vmul.f32 1.442695, %v586_v26  ;;  %v565_v32 = vmax.f32 %v563_v21, %v564_v27  ;;  %v523_v36 = vsel %vm100_vm6, -1e+30, %v496_v28  ;;  %v624_v38 = vadd.f32 %v623_v37, %v622_v19 }
 0x243   :  { %v627_v39 = vsel %vm525_vm13, %v1537_v30, 0.0  ;;  %v568_v53 = vsel %vm525_vm13, %v523_v36, -inf  ;;  %1470 = vmatmul.msk.f32.vlgmr.msra.gmra.mxu2 %vm525_vm13, %v670_v29  ;;  %1478 = vmatmul.msk.f32.vlgmr.msra.gmra.mxu3 %vm525_vm13, %v670_v29 }
 0x244   :  { %v628_v51 = vrot.slane %v627_v39, 4  ;;  %1540 = vpow2.f32 %v598_v31  ;;  %v566_v41 = vrot.slane %v565_v32, 1  ;;  %v569_v42 = vrot.slane %v568_v53, 4  ;;  %v803_v31 = vld [vmem:[%s2508_s6 + $0x78] sm:$0xff] }
 0x245   :  { %v625_v43 = vrot.slane %v624_v38, 1  ;;  %859 = vmatpush.msrb.mxu2 %v803_v31  ;;  %v1022_v31 = vld [vmem:[%s2511_s9 + $0x90] sm:$0xff] }
 0x246   :  { %v629_v16 = vadd.f32 %v628_v51, %v627_v39  ;;  %v567_v44 = vmax.f32 %v565_v32, %v566_v41  ;;  %v570_v45 = vmax.f32 %v568_v53, %v569_v42 }
 0x247   :  { %v1539_v6 = vpop.eup %1538  ;;  %v626_v49 = vadd.f32 %v625_v43, %v624_v38 }
 0x248   :  { %v630_v7 = vrot.slane %v629_v16, 2  ;;  %v587_v50 = vsub.f32 %v522_v62, %v567_v44  ;;  %v571_v52 = vrot.slane %v570_v45, 2  ;;  %v671_v54 = vmul.f32 %v1539_v6, %v1949_v35 }
 0x249   :  { %1542 = vrcp.f32 %v626_v49 }
 0x24a   :  { %v1541_v55 = vpop.eup %1540  ;;  %v600_v58 = vmul.f32 1.442695, %v587_v50  ;;  %v572_v56 = vmax.f32 %v570_v45, %v571_v52  ;;  %v631_v59 = vadd.f32 %v630_v7, %v629_v16  ;;  %v1990_v7 = vpop.xlane.xlu2 %84 }
 0x24b   :  { %v634_v61 = vsel %vm525_vm13, %v1541_v55, 0.0  ;;  %1471 = vmatmul.msk.f32.gmra.mxu2 %vm525_vm13, %v671_v54  ;;  %1479 = vmatmul.msk.f32.gmra.mxu3 %vm525_vm13, %v671_v54  ;;  %v93_v50 = vand.u32 2147483647, %v1990_v7 }
 0x24c   :  { %v635_v46 = vrot.slane %v634_v61, 4  ;;  %1544 = vpow2.f32 %v600_v58  ;;  %v573_v0 = vrot.slane %v572_v56, 1  ;;  %v632_v63 = vrot.slane %v631_v59, 1  ;;  %v799_v58 = vld [vmem:[%s2508_s6 + $0x58] sm:$0xff] }
 0x24d   :  { %vm101_vm7 = vcmp.eq.f32.partialorder %v93_v50, 0.0 }
 0x24e   :  { %v636_v10 = vadd.f32 %v635_v46, %v634_v61  ;;  %v574_v62 = vmax.f32 %v572_v56, %v573_v0  ;;  %v633_v13 = vadd.f32 %v632_v63, %v631_v59  ;;  %v797_v59 = vld [vmem:[%s2508_s6 + $0x48] sm:$0xff] }
 0x24f   :  { %v1543_v14 = vpop.eup %1542  ;;  %v793_v63 = vld [vmem:[%s2508_s6 + $0x28] sm:$0xff] }
 0x250   :  { %v637_v35 = vrot.slane %v636_v10, 2  ;;  %v588_v3 = vsub.f32 %v523_v36, %v574_v62  ;;  %v672_v18 = vmul.f32 %v1543_v14, %v1958_v60  ;;  %1546 = vrcp.f32 %v633_v13  ;;  %v791_v62 = vld [vmem:[%s2508_s6 + $0x18] sm:$0xff] }
 0x252   :  { %v1545_v40 = vpop.eup %1544  ;;  %v602_v19 = vmul.f32 1.442695, %v588_v3  ;;  %v638_v17 = vadd.f32 %v637_v35, %v636_v10 }
 0x253   :  { %v641_v21 = vsel %vm525_vm13, %v1545_v40, 0.0  ;;  %1472 = vmatmul.msk.f32.gmra.mxu2 %vm525_vm13, %v672_v18  ;;  %1480 = vmatmul.msk.f32.gmra.mxu3 %vm525_vm13, %v672_v18 }
 0x254   :  { %v642_v22 = vrot.slane %v641_v21, 4  ;;  %1548 = vpow2.f32 %v602_v19  ;;  %v639_v8 = vrot.slane %v638_v17, 1 }
 0x256   :  { %v1547_v25 = vpop.eup %1546  ;;  %v643_v37 = vadd.f32 %v642_v22, %v641_v21  ;;  %v640_v26 = vadd.f32 %v639_v8, %v638_v17 }
 0x257   :  { %v673_v27 = vmul.f32 %v1547_v25, %v1537_v30 }
 0x258   :  { %v644_v28 = vrot.slane %v643_v37, 2  ;;  %1550 = vrcp.f32 %v640_v26 }
 0x25a   :  { %v1549_v60 = vpop.eup %1548  ;;  %v645_v29 = vadd.f32 %v644_v28, %v643_v37 }
 0x25b   :  { %v648_v32 = vsel %vm525_vm13, %v1549_v60, 0.0  ;;  %1473 = vmatmul.msk.f32.gmra.mxu2 %vm525_vm13, %v673_v27  ;;  %1481 = vmatmul.msk.f32.gmra.mxu3 %vm525_vm13, %v673_v27 }
 0x25c   :  { %v649_v36 = vrot.slane %v648_v32, 4  ;;  %v646_v38 = vrot.slane %v645_v29, 1 }
 0x25e   :  { %v1551_v39 = vpop.eup %1550  ;;  %v650_v53 = vadd.f32 %v649_v36, %v648_v32  ;;  %v647_v30 = vadd.f32 %v646_v38, %v645_v29  ;;  %v1032_v29 = vld [vmem:[%s2511_s9 + $0xe0] sm:$0xff]  ;;  %v1018_v36 = vld [vmem:[%s2511_s9 + $0x70] sm:$0xff] }
 0x25f   :  { %v674_v51 = vmul.f32 %v1551_v39, %v1541_v55  ;;  %v801_v55 = vld [vmem:[%s2508_s6 + $0x68] sm:$0xff]  ;;  %v1020_v32 = vld [vmem:[%s2511_s9 + $0x80] sm:$0xff]  ;;  %v1014_v38 = vld [vmem:[%s2511_s9 + $0x50] sm:$0xff]  ;;  %v827_v39 = vpop.f32.mrf.mxu0 }
 0x260   :  { %v651_v41 = vrot.slane %v650_v53, 2  ;;  %1552 = vrcp.f32 %v647_v30  ;;  %860 = vmatpush.msrb.mxu2 %v801_v55 }
 0x262   :  { %v652_v42 = vadd.f32 %v651_v41, %v650_v53  ;;  %861 = vmatpush.msrb.mxu2 %v799_v58  ;;  %v1012_v53 = vld [vmem:[%s2511_s9 + $0x40] sm:$0xff]  ;;  %v1006_v41 = vld [vmem:[%s2511_s9 + $0x10] sm:$0xff] }
 0x263   :  { %1474 = vmatmul.msk.f32.gmra.mxu2 %vm525_vm13, %v674_v51  ;;  %1482 = vmatmul.msk.f32.gmra.mxu3 %vm525_vm13, %v674_v51  ;;  %v1008_v51 = vld [vmem:[%s2511_s9 + $0x20] sm:$0xff] }
 0x264   :  { %v653_v43 = vrot.slane %v652_v42, 1  ;;  %862 = vmatpush.msrb.mxu2 %v797_v59  ;;  %v1025_v59 = vld [vmem:[%s2511_s9 + $0xa8] sm:$0xff] }
 0x266   :  { %v1553_v16 = vpop.eup %1552  ;;  %v654_v44 = vadd.f32 %v653_v43, %v652_v42  ;;  %v1004_v42 = vld [vmem:[%s2511_s9] sm:$0xff]  ;;  %v1035_v43 = vld [vmem:[%s2511_s9 + $0xf8] sm:$0xff] }
 0x267   :  { %v675_v45 = vmul.f32 %v1553_v16, %v1545_v40  ;;  %v789_v40 = vld [vmem:[%s2508_s6 + $0x8] sm:$0xff] }
 0x268   :  { %1554 = vrcp.f32 %v654_v44  ;;  %v1033_v16 = vld [vmem:[%s2511_s9 + $0xe8] sm:$0xff] }
 0x26b   :  { %1475 = vmatmul.msk.f32.gmra.mxu2 %vm525_vm13, %v675_v45  ;;  %1483 = vmatmul.msk.f32.gmra.mxu3 %vm525_vm13, %v675_v45  ;;  %v1031_v45 = vld [vmem:[%s2511_s9 + $0xd8] sm:$0xff] }
 0x26e   :  { %v1555_v6 = vpop.eup %1554 }
 0x26f   :  { %v676_v49 = vmul.f32 %v1555_v6, %v1549_v60  ;;  %v1034_v60 = vld [vmem:[%s2511_s9 + $0xf0] sm:$0xff]  ;;  %v1029_v6 = vld [vmem:[%s2511_s9 + $0xc8] sm:$0xff] }
 0x270   :  { %1113 = vmatpush.msrb.mxu3 %v1034_v60 }
 0x272   :  { %1114 = vmatpush.msrb.mxu3 %v1032_v29 }
 0x273   :  { %1476 = vmatmul.msk.f32.gmra.mxu2 %vm525_vm13, %v676_v49  ;;  %1484 = vmatmul.msk.f32.gmra.mxu3 %vm525_vm13, %v676_v49 }
 0x292   :  { %v498_v52 = vpop.f32.mrf.mxu1 }
 0x293   :  { %v499_v54 = vadd.f32 %v1901_v24, %v498_v52  ;;  %v795_v24 = vld [vmem:[%s2508_s6 + $0x38] sm:$0xff] }
 0x294   :  { %863 = vmatpush.msrb.mxu2 %v795_v24  ;;  %v1023_v24 = vld [vmem:[%s2511_s9 + $0x98] sm:$0xff] }
 0x295   :  { %v524_v56 = vsel %vm101_vm7, -1e+30, %v499_v54 }
 0x296   :  { %v575_v61 = vsel %vm525_vm13, %v524_v56, -inf  ;;  %864 = vmatpush.msrb.mxu2 %v793_v63 }
 0x297   :  { %v576_v46 = vrot.slane %v575_v61, 4 }
 0x298   :  { %865 = vmatpush.msrb.mxu2 %v791_v62 }
 0x299   :  { %v577_v0 = vmax.f32 %v575_v61, %v576_v46  ;;  %v2104_v46 = vld [vmem:[%s2512_s7] sm:$0x3] }
 0x29a   :  { %866 = vmatpush.msrb.mxu2 %v789_v40  ;;  %v806_v63 = vperm.slane %v2104_v46, 0 }
 0x29b   :  { %v578_v10 = vrot.slane %v577_v0, 2 }
 0x29d   :  { %v579_v13 = vmax.f32 %v577_v0, %v578_v10  ;;  %v1021_v0 = vld [vmem:[%s2511_s9 + $0x88] sm:$0xff]  ;;  %v1019_v10 = vld [vmem:[%s2511_s9 + $0x78] sm:$0xff] }
 0x29f   :  { %v580_v14 = vrot.slane %v579_v13, 1 }
 0x2a1   :  { %v581_v35 = vmax.f32 %v579_v13, %v580_v14  ;;  %v1017_v14 = vld [vmem:[%s2511_s9 + $0x68] sm:$0xff] }
 0x2a3   :  { %v589_v3 = vsub.f32 %v524_v56, %v581_v35  ;;  %v828_v35 = vadd.f32 %v827_v39, %v806_v63 }
 0x2a5   :  { %v604_v18 = vmul.f32 1.442695, %v589_v3 }
 0x2a7   :  { %1556 = vpow2.f32 %v604_v18 }
 0x2ad   :  { %v1557_v19 = vpop.eup %1556 }
 0x2ae   :  { %v655_v17 = vsel %vm525_vm13, %v1557_v19, 0.0 }
 0x2af   :  { %v656_v21 = vrot.slane %v655_v17, 4 }
 0x2b1   :  { %v657_v22 = vadd.f32 %v656_v21, %v655_v17  ;;  %v1015_v21 = vld [vmem:[%s2511_s9 + $0x58] sm:$0xff] }
 0x2b3   :  { %v658_v8 = vrot.slane %v657_v22, 2 }
 0x2b5   :  { %v659_v25 = vadd.f32 %v658_v8, %v657_v22 }
 0x2b7   :  { %v660_v37 = vrot.slane %v659_v25, 1 }
 0x2b9   :  { %v661_v26 = vadd.f32 %v660_v37, %v659_v25 }
 0x2bb   :  { %1558 = vrcp.f32 %v661_v26 }
 0x2c1   :  { %v1559_v27 = vpop.eup %1558 }
 0x2c2   :  { %v677_v28 = vmul.f32 %v1559_v27, %v1557_v19 }
 0x2c4   :  { %1477 = vmatmul.msk.f32.gmra.mxu2 %vm525_vm13, %v677_v28  ;;  %1485 = vmatmul.msk.f32.gmra.mxu3 %vm525_vm13, %v677_v28  ;;  %v1013_v28 = vld [vmem:[%s2511_s9 + $0x48] sm:$0xff]  ;;  %vm1102_vm13 = vcmask 1047559  }
 0x2c6   :  { %v723_v30 = vpop.f32.mrf.mxu2 }
 0x2c7   :  { %v892_v8 = vmul.f32 %v828_v35, %v723_v30  ;;  %v1007_v30 = vld [vmem:[%s2511_s9 + $0x18] sm:$0xff] }
 0x2cc   :  { %1494 = vmatmul.msk.f32.vlgmr.msrb.gmra.mxu2 %vm240_vm2, %v1832_v11  ;;  %v1030_v11 = vld [vmem:[%s2511_s9 + $0xd0] sm:$0xff] }
 0x2cd   :  { %1115 = vmatpush.msrb.mxu3 %v1030_v11 }
 0x2ce   :  { %v726_v44 = vpop.f32.mrf.mxu2 }
 0x2d4   :  { %1495 = vmatmul.msk.f32.gmra.mxu2 %vm240_vm2, %v1842_v23  ;;  %v1028_v23 = vld [vmem:[%s2511_s9 + $0xc0] sm:$0xff] }
 0x2d5   :  { %1116 = vmatpush.msrb.mxu3 %v1028_v23 }
 0x2d6   :  { %v729_v50 = vpop.f32.mrf.mxu2 }
 0x2dc   :  { %1496 = vmatmul.msk.f32.gmra.mxu2 %vm240_vm2, %v1852_v33  ;;  %v1026_v33 = vld [vmem:[%s2511_s9 + $0xb0] sm:$0xff] }
 0x2dd   :  { %1117 = vmatpush.msrb.mxu3 %v1026_v33  ;;  %v1011_v33 = vld [vmem:[%s2511_s9 + $0x38] sm:$0xff] }
 0x2de   :  { %v732_v54 = vpop.f32.mrf.mxu2 }
 0x2e4   :  { %1497 = vmatmul.msk.f32.gmra.mxu2 %vm240_vm2, %v1864_v48  ;;  %v1024_v48 = vld [vmem:[%s2511_s9 + $0xa0] sm:$0xff] }
 0x2e5   :  { %1118 = vmatpush.msrb.mxu3 %v1024_v48  ;;  %v908_v48 = vrot.slane %v892_v8, 4 }
 0x2e6   :  { %v735_v58 = vpop.f32.mrf.mxu2 }
 0x2e7   :  { %1119 = vmatpush.msrb.mxu3 %v1022_v31 }
 0x2e9   :  { %1120 = vmatpush.msrb.mxu3 %v1020_v32 }
 0x2eb   :  { %1121 = vmatpush.msrb.mxu3 %v1018_v36  ;;  %v1009_v36 = vld [vmem:[%s2511_s9 + $0x28] sm:$0xff] }
 0x2ec   :  { %1498 = vmatmul.msk.f32.gmra.mxu2 %vm240_vm2, %v1872_v57  ;;  %v1016_v57 = vld [vmem:[%s2511_s9 + $0x60] sm:$0xff] }
 0x2ed   :  { %1122 = vmatpush.msrb.mxu3 %v1016_v57 }
 0x2ee   :  { %v738_v61 = vpop.f32.mrf.mxu2 }
 0x2ef   :  { %1123 = vmatpush.msrb.mxu3 %v1014_v38 }
 0x2f1   :  { %1124 = vmatpush.msrb.mxu3 %v1012_v53 }
 0x2f4   :  { %1499 = vmatmul.msk.f32.gmra.mxu2 %vm240_vm2, %v1879_v9  ;;  %v1010_v9 = vld [vmem:[%s2511_s9 + $0x30] sm:$0xff] }
 0x2f5   :  { %1125 = vmatpush.msrb.mxu3 %v1010_v9  ;;  %v909_v9 = vadd.f32 %v908_v48, %v892_v8 }
 0x2f6   :  { %v741_v37 = vpop.f32.mrf.mxu2 }
 0x2f7   :  { %1126 = vmatpush.msrb.mxu3 %v1008_v51 }
 0x2f9   :  { %1127 = vmatpush.msrb.mxu3 %v1006_v41 }
 0x2fb   :  { %1128 = vmatpush.msrb.mxu3 %v1004_v42  ;;  %v1005_v42 = vld [vmem:[%s2511_s9 + $0x8] sm:$0xff] }
 0x2fc   :  { %1500 = vmatmul.msk.f32.gmra.mxu2 %vm240_vm2, %v1886_v15  ;;  %v830_v15 = vpop.f32.mrf.mxu0 }
 0x2fd   :  { %1153 = vmatpush.msra.mxu3 %v1035_v43  ;;  %v831_v62 = vadd.f32 %v830_v15, %v806_v63 }
 0x2ff   :  { %1154 = vmatpush.msra.mxu3 %v1033_v16  ;;  %v894_v40 = vmul.f32 %v831_v62, %v726_v44 }
 0x301   :  { %1155 = vmatpush.msra.mxu3 %v1031_v45  ;;  %v920_v60 = vrot.slane %v894_v40, 4  ;;  %v910_v45 = vrot.slane %v909_v9, 2 }
 0x303   :  { %1156 = vmatpush.msra.mxu3 %v1029_v6  ;;  %v921_v57 = vadd.f32 %v920_v60, %v894_v40 }
 0x304   :  { %1501 = vmatmul.msk.f32.gmra.mxu2 %vm240_vm2, %v1908_v47  ;;  %v833_v49 = vpop.f32.mrf.mxu0  ;;  %v1027_v47 = vld [vmem:[%s2511_s9 + $0xb8] sm:$0xff] }
 0x305   :  { %1157 = vmatpush.msra.mxu3 %v1027_v47  ;;  %v834_v13 = vadd.f32 %v833_v49, %v806_v63  ;;  %v922_v43 = vrot.slane %v921_v57, 2 }
 0x307   :  { %1158 = vmatpush.msra.mxu3 %v1025_v59  ;;  %v896_v17 = vmul.f32 %v834_v13, %v729_v50 }
 0x309   :  { %1159 = vmatpush.msra.mxu3 %v1023_v24  ;;  %v932_v11 = vrot.slane %v896_v17, 4 }
 0x30b   :  { %1160 = vmatpush.msra.mxu3 %v1021_v0  ;;  %v933_v39 = vadd.f32 %v932_v11, %v896_v17  ;;  %v1064_v0 = vld [vmem:[%s2511_s9 + $0x1e0] sm:$0xff] }
 0x30c   :  { %v836_v52 = vpop.f32.mrf.mxu0 }
 0x30d   :  { %1161 = vmatpush.msra.mxu3 %v1019_v10  ;;  %v837_v3 = vadd.f32 %v836_v52, %v806_v63  ;;  %v934_v16 = vrot.slane %v933_v39, 2  ;;  %v923_v52 = vadd.f32 %v922_v43, %v921_v57 }
 0x30f   :  { %1162 = vmatpush.msra.mxu3 %v1017_v14  ;;  %v898_v25 = vmul.f32 %v837_v3, %v732_v54  ;;  %v935_v47 = vadd.f32 %v934_v16, %v933_v39  ;;  %v924_v13 = vrot.slane %v923_v52, 1  ;;  %v1062_v3 = vld [vmem:[%s2511_s9 + $0x1d0] sm:$0xff] }
 0x311   :  { %1163 = vmatpush.msra.mxu3 %v1015_v21  ;;  %v944_v31 = vrot.slane %v898_v25, 4  ;;  %v1060_v21 = vld [vmem:[%s2511_s9 + $0x1c0] sm:$0xff]  ;;  %v925_v8 = vadd.f32 %v924_v13, %v923_v52  ;;  %v1061_v13 = vld [vmem:[%s2511_s9 + $0x1c8] sm:$0xff] }
 0x312   :  { %v1044_v52 = vld [vmem:[%s2511_s9 + $0x140] sm:$0xff] }
 0x313   :  { %1164 = vmatpush.msra.mxu3 %v1013_v28  ;;  %v945_v51 = vadd.f32 %v944_v31, %v898_v25 }
 0x314   :  { %v839_v55 = vpop.f32.mrf.mxu0 }
 0x315   :  { %v840_v19 = vadd.f32 %v839_v55, %v806_v63  ;;  %1165 = vmatpush.msra.mxu3 %v1011_v33  ;;  %v946_v6 = vrot.slane %v945_v51, 2  ;;  %v1066_v55 = vld [vmem:[%s2511_s9 + $0x1f0] sm:$0xff] }
 0x316   :  { %1133 = vmatpush.msrb.mxu1 %v1066_v55  ;;  %v1040_v55 = vld [vmem:[%s2511_s9 + $0x120] sm:$0xff] }
 0x317   :  { %v900_v27 = vmul.f32 %v840_v19, %v735_v58  ;;  %1166 = vmatpush.msra.mxu3 %v1009_v36  ;;  %v2140_v58 = vpop.f32.mrf.mxu3  ;;  %v947_v24 = vadd.f32 %v946_v6, %v945_v51  ;;  %v1052_v51 = vld [vmem:[%s2511_s9 + $0x180] sm:$0xff] }
 0x318   :  { %1134 = vmatpush.msrb.mxu1 %v1064_v0  ;;  %v1065_v0 = vld [vmem:[%s2511_s9 + $0x1e8] sm:$0xff] }
 0x319   :  { %v956_v32 = vrot.slane %v900_v27, 4  ;;  %1167 = vmatpush.msra.mxu3 %v1007_v30  ;;  %v948_v19 = vrot.slane %v947_v24, 1 }
 0x31a   :  { %1135 = vmatpush.msrb.mxu1 %v1062_v3  ;;  %v1057_v3 = vld [vmem:[%s2511_s9 + $0x1a8] sm:$0xff] }
 0x31b   :  { %v957_v41 = vadd.f32 %v956_v32, %v900_v27  ;;  %1168 = vmatpush.msra.mxu3 %v1005_v42 }
 0x31c   :  { %v842_v56 = vpop.f32.mrf.mxu0  ;;  %1136 = vmatpush.msrb.mxu1 %v1060_v21  ;;  %v1051_v21 = vld [vmem:[%s2511_s9 + $0x178] sm:$0xff] }
 0x31d   :  { %v843_v22 = vadd.f32 %v842_v56, %v806_v63  ;;  %v958_v50 = vrot.slane %v957_v41, 2 }
 0x31f   :  { %v902_v29 = vmul.f32 %v843_v22, %v738_v61  ;;  %v911_v61 = vadd.f32 %v910_v45, %v909_v9  ;;  %v959_v10 = vadd.f32 %v958_v50, %v957_v41  ;;  %v2157_v33 = vpop.f32.mrf.mxu3  ;;  %v1048_v45 = vld [vmem:[%s2511_s9 + $0x160] sm:$0xff] }
 0x321   :  { %v968_v38 = vrot.slane %v902_v29, 4  ;;  %v960_v22 = vrot.slane %v959_v10, 1 }
 0x323   :  { %v969_v15 = vadd.f32 %v968_v38, %v902_v29  ;;  %v949_v29 = vadd.f32 %v948_v19, %v947_v24  ;;  %v961_v48 = vadd.f32 %v960_v22, %v959_v10  ;;  %v1054_v38 = vld [vmem:[%s2511_s9 + $0x190] sm:$0xff]  ;;  %v1067_v24 = vld [vmem:[%s2511_s9 + $0x1f8] sm:$0xff]  ;;  %v1053_v19 = vld [vmem:[%s2511_s9 + $0x188] sm:$0xff] }
 0x324   :  { %v845_v18 = vpop.f32.mrf.mxu0 }
 0x325   :  { %v846_v26 = vadd.f32 %v845_v18, %v806_v63  ;;  %v970_v54 = vrot.slane %v969_v15, 2  ;;  %v936_v18 = vrot.slane %v935_v47, 1 }
 0x327   :  { %v904_v23 = vmul.f32 %v846_v26, %v741_v37  ;;  %v971_v14 = vadd.f32 %v970_v54, %v969_v15  ;;  %v1058_v26 = vld [vmem:[%s2511_s9 + $0x1b0] sm:$0xff]  ;;  %v937_v27 = vadd.f32 %v936_v18, %v935_v47  ;;  %v770_v50 = vpop.f32.mrf.mxu3 }
 0x328   :  { %1137 = vmatpush.msrb.mxu1 %v1058_v26  ;;  %v1050_v15 = vld [vmem:[%s2511_s9 + $0x170] sm:$0xff]  ;;  %v1047_v26 = vld [vmem:[%s2511_s9 + $0x158] sm:$0xff] }
 0x329   :  { %v980_v53 = vrot.slane %v904_v23, 4  ;;  %v972_v25 = vrot.slane %v971_v14, 1  ;;  %v1042_v54 = vld [vmem:[%s2511_s9 + $0x130] sm:$0xff] }
 0x32b   :  { %v981_v44 = vadd.f32 %v980_v53, %v904_v23  ;;  %v1056_v23 = vld [vmem:[%s2511_s9 + $0x1a0] sm:$0xff]  ;;  %v973_v36 = vadd.f32 %v972_v25, %v971_v14  ;;  %v1059_v14 = vld [vmem:[%s2511_s9 + $0x1b8] sm:$0xff] }
 0x32c   :  { %v848_v49 = vpop.f32.mrf.mxu0  ;;  %1138 = vmatpush.msrb.mxu1 %v1056_v23 }
 0x32d   :  { %v982_v56 = vrot.slane %v981_v44, 2  ;;  %v849_v59 = vadd.f32 %v848_v49, %v806_v63  ;;  %v912_v63 = vrot.slane %v911_v61, 1  ;;  %v1046_v49 = vld [vmem:[%s2511_s9 + $0x150] sm:$0xff] }
 0x32e   :  { %1139 = vmatpush.msrb.mxu1 %v1054_v38 }
 0x32f   :  { %v983_v40 = vadd.f32 %v982_v56, %v981_v44  ;;  %v913_v60 = vadd.f32 %v912_v63, %v911_v61  ;;  %v1038_v56 = vld [vmem:[%s2511_s9 + $0x110] sm:$0xff]  ;;  %v773_v61 = vpop.f32.mrf.mxu3  ;;  %v2220_v63 = vperm.slane %v2104_v46, 1 }
 0x330   :  { %1140 = vmatpush.msrb.mxu1 %v1052_v51 }
 0x331   :  { %v984_v28 = vrot.slane %v983_v40, 1  ;;  %v1091_v32 = vsel %vm1090_vm8, %v925_v8, %v913_v60  ;;  %v1049_v8 = vld [vmem:[%s2511_s9 + $0x168] sm:$0xff] }
 0x332   :  { %v1093_v39 = vsel %vm1092_vm9, %v937_v27, %v1091_v32  ;;  %1141 = vmatpush.msrb.mxu1 %v1050_v15  ;;  %v1037_v15 = vld [vmem:[%s2511_s9 + $0x108] sm:$0xff] }
 0x333   :  { %v985_v53 = vadd.f32 %v984_v28, %v983_v40  ;;  %v1095_v9 = vsel %vm1094_vm10, %v949_v29, %v1093_v39  ;;  %v1055_v40 = vld [vmem:[%s2511_s9 + $0x198] sm:$0xff]  ;;  %v1041_v39 = vld [vmem:[%s2511_s9 + $0x128] sm:$0xff] }
 0x334   :  { %v1097_v41 = vsel %vm1096_vm1, %v961_v48, %v1095_v9  ;;  %1142 = vmatpush.msrb.mxu1 %v1048_v45  ;;  %v1039_v9 = vld [vmem:[%s2511_s9 + $0x118] sm:$0xff] }
 0x335   :  { %v1099_v43 = vsel %vm1098_vm11, %v973_v36, %v1097_v41  ;;  %v1043_v36 = vld [vmem:[%s2511_s9 + $0x138] sm:$0xff] }
 0x336   :  { %v1101_v16 = vsel %vm1100_vm12, %v985_v53, %v1099_v43  ;;  %1143 = vmatpush.msrb.mxu1 %v1046_v49 }
 0x338   :  { %1144 = vmatpush.msrb.mxu1 %v1044_v52 }
 0x33a   :  { %1145 = vmatpush.msrb.mxu1 %v1042_v54 }
 0x33c   :  { %1146 = vmatpush.msrb.mxu1 %v1040_v55 }
 0x33e   :  { %1147 = vmatpush.msrb.mxu1 %v1038_v56 }
 0x347   :  { %v744_v62 = vpop.f32.mrf.mxu2 }
 0x348   :  { %v906_v35 = vmul.f32 %v849_v59, %v744_v62  ;;  %v1036_v59 = vld [vmem:[%s2511_s9 + $0x100] sm:$0xff]  ;;  %v1063_v62 = vld [vmem:[%s2511_s9 + $0x1d8] sm:$0xff] }
 0x349   :  { %1148 = vmatpush.msrb.mxu1 %v1036_v59 }
 0x34a   :  { %v992_v17 = vrot.slane %v906_v35, 4 }
 0x34b   :  { %1173 = vmatpush.msra.mxu1 %v1067_v24 }
 0x34c   :  { %v993_v37 = vadd.f32 %v992_v17, %v906_v35  ;;  %v776_v35 = vpop.f32.mrf.mxu3 }
 0x34d   :  { %1174 = vmatpush.msra.mxu1 %v1065_v0 }
 0x34e   :  { %v994_v11 = vrot.slane %v993_v37, 2 }
 0x34f   :  { %v2159_v31 = vpop.f32.mrf.mxu2  ;;  %1175 = vmatpush.msra.mxu1 %v1063_v62 }
 0x350   :  { %v995_v57 = vadd.f32 %v994_v11, %v993_v37  ;;  %v869_v46 = vadd.f32 %v2159_v31, %v2220_v63  ;;  %v1045_v11 = vld [vmem:[%s2511_s9 + $0x148] sm:$0xff] }
 0x351   :  { %1176 = vmatpush.msra.mxu1 %v1061_v13 }
 0x352   :  { %v996_v30 = vrot.slane %v995_v57, 1  ;;  %v893_v23 = vmul.f32 %v869_v46, %v2140_v58 }
 0x353   :  { %1177 = vmatpush.msra.mxu1 %v1059_v14 }
 0x354   :  { %v997_v42 = vadd.f32 %v996_v30, %v995_v57  ;;  %v779_v28 = vpop.f32.mrf.mxu3  ;;  %v914_v53 = vrot.slane %v893_v23, 4 }
 0x355   :  { %1178 = vmatpush.msra.mxu1 %v1057_v3 }
 0x356   :  { %v1103_v44 = vsel %vm1102_vm13, %v997_v42, %v1101_v16  ;;  %v915_v16 = vadd.f32 %v914_v53, %v893_v23 }
 0x357   :  { %v871_v6 = vpop.f32.mrf.mxu2  ;;  %1129 = vmatmul.f32.vlgmr.msrb.gmra.mxu3 %v1103_v44  ;;  %1179 = vmatpush.msra.mxu1 %v1055_v40 }
 0x358   :  { %v872_v17 = vadd.f32 %v871_v6, %v2220_v63 }
 0x359   :  { %1180 = vmatpush.msra.mxu1 %v1053_v19 }
 0x35a   :  { %v895_v27 = vmul.f32 %v872_v17, %v2157_v33 }
 0x35b   :  { %1181 = vmatpush.msra.mxu1 %v1051_v21 }
 0x35c   :  { %v926_v33 = vrot.slane %v895_v27, 4  ;;  %v782_v6 = vpop.f32.mrf.mxu3 }
 0x35d   :  { %1182 = vmatpush.msra.mxu1 %v1049_v8 }
 0x35e   :  { %v927_v51 = vadd.f32 %v926_v33, %v895_v27 }
 0x35f   :  { %v874_v47 = vpop.f32.mrf.mxu2  ;;  %1169 = vmatmul.f32.vlgmr.msra.gmra.mxu3 %v1103_v44  ;;  %1183 = vmatpush.msra.mxu1 %v1047_v26 }
 0x360   :  { %v875_v22 = vadd.f32 %v874_v47, %v2220_v63  ;;  %v916_v47 = vrot.slane %v915_v16, 2 }
 0x361   :  { %1184 = vmatpush.msra.mxu1 %v1045_v11 }
 0x362   :  { %v897_v60 = vmul.f32 %v875_v22, %v770_v50  ;;  %v928_v50 = vrot.slane %v927_v51, 2  ;;  %v917_v14 = vadd.f32 %v916_v47, %v915_v16  ;;  %v1275_v16 = vld [vmem:[%s2513_s12 + $0x78] sm:$0xff]  ;;  %v1270_v47 = vld [vmem:[%s2513_s12 + $0x50] sm:$0xff] }
 0x363   :  { %1185 = vmatpush.msra.mxu1 %v1043_v36  ;;  %1338 = vmatpush.msra.mxu0 %v1275_v16 }
 0x364   :  { %v938_v38 = vrot.slane %v897_v60, 4  ;;  %v929_v24 = vadd.f32 %v928_v50, %v927_v51  ;;  %v785_v40 = vpop.f32.mrf.mxu3  ;;  %v1272_v50 = vld [vmem:[%s2513_s12 + $0x60] sm:$0xff] }
 0x365   :  { %1186 = vmatpush.msra.mxu1 %v1041_v39 }
 0x366   :  { %v939_v42 = vadd.f32 %v938_v38, %v897_v60  ;;  %v930_v17 = vrot.slane %v929_v24, 1 }
 0x367   :  { %v877_v10 = vpop.f32.mrf.mxu2  ;;  %1187 = vmatpush.msra.mxu1 %v1039_v9 }
 0x368   :  { %v878_v25 = vadd.f32 %v877_v10, %v2220_v63  ;;  %v940_v55 = vrot.slane %v939_v42, 2 }
 0x369   :  { %1188 = vmatpush.msra.mxu1 %v1037_v15  ;;  %v1290_v15 = vld [vmem:[%s2513_s12 + $0xf0] sm:$0xff] }
 0x36a   :  { %v899_v48 = vmul.f32 %v878_v25, %v773_v61  ;;  %v941_v62 = vadd.f32 %v940_v55, %v939_v42  ;;  %v918_v25 = vrot.slane %v917_v14, 1  ;;  %v1286_v55 = vld [vmem:[%s2513_s12 + $0xd0] sm:$0xff] }
 0x36c   :  { %v950_v30 = vrot.slane %v899_v48, 4  ;;  %v942_v8 = vrot.slane %v941_v62, 1 }
 0x36e   :  { %v951_v44 = vadd.f32 %v950_v30, %v899_v48  ;;  %v943_v11 = vadd.f32 %v942_v8, %v941_v62  ;;  %v919_v48 = vadd.f32 %v918_v25, %v917_v14  ;;  %v1282_v62 = vld [vmem:[%s2513_s12 + $0xb0] sm:$0xff]  ;;  %v126_v8 = vrot.slane %v1938_v12, 4 }
 0x36f   :  { %v880_v18 = vpop.f32.mrf.mxu2  ;;  %v1266_v14 = vld [vmem:[%s2513_s12 + $0x30] sm:$0xff] }
 0x370   :  { %v881_v37 = vadd.f32 %v880_v18, %v2220_v63  ;;  %v952_v56 = vrot.slane %v951_v44, 2 }
 0x372   :  { %v901_v32 = vmul.f32 %v881_v37, %v776_v35  ;;  %v953_v35 = vadd.f32 %v952_v56, %v951_v44  ;;  %v1274_v44 = vld [vmem:[%s2513_s12 + $0x70] sm:$0xff]  ;;  %v1285_v56 = vld [vmem:[%s2513_s12 + $0xc8] sm:$0xff] }
 0x373   :  { %1339 = vmatpush.msra.mxu0 %v1274_v44 }
 0x374   :  { %v962_v58 = vrot.slane %v901_v32, 4  ;;  %v954_v37 = vrot.slane %v953_v35, 1 }
 0x376   :  { %v963_v49 = vadd.f32 %v962_v58, %v901_v32 }
 0x377   :  { %v883_v29 = vpop.f32.mrf.mxu2 }
 0x378   :  { %v884_v31 = vadd.f32 %v883_v29, %v2220_v63  ;;  %v964_v61 = vrot.slane %v963_v49, 2 }
 0x37a   :  { %v903_v57 = vmul.f32 %v884_v31, %v779_v28  ;;  %v965_v19 = vadd.f32 %v964_v61, %v963_v49  ;;  %v931_v28 = vadd.f32 %v930_v17, %v929_v24  ;;  %v955_v31 = vadd.f32 %v954_v37, %v953_v35  ;;  %v1288_v49 = vld [vmem:[%s2513_s12 + $0xe0] sm:$0xff] }
 0x37b   :  { %v1284_v61 = vld [vmem:[%s2513_s12 + $0xc0] sm:$0xff]  ;;  %v108_v17 = vrot.slane %v1904_v4, 4 }
 0x37c   :  { %v974_v41 = vrot.slane %v903_v57, 4  ;;  %v966_v27 = vrot.slane %v965_v19, 1  ;;  %v1104_v36 = vsel %vm1090_vm8, %v931_v28, %v919_v48  ;;  %v1268_v24 = vld [vmem:[%s2513_s12 + $0x40] sm:$0xff]  ;;  %v1262_v28 = vld [vmem:[%s2513_s12 + $0x10] sm:$0xff] }
 0x37d   :  { %v1105_v39 = vsel %vm1092_vm9, %v943_v11, %v1104_v36  ;;  %v1280_v35 = vld [vmem:[%s2513_s12 + $0xa0] sm:$0xff]  ;;  %v109_v37 = vadd.f32 %v108_v17, %v1904_v4  ;;  %v138_v4 = vrot.slane %v1956_v2, 4 }
 0x37e   :  { %v975_v52 = vadd.f32 %v974_v41, %v903_v57  ;;  %v1106_v30 = vsel %vm1094_vm10, %v955_v31, %v1105_v39 }
 0x37f   :  { %v886_v43 = vpop.f32.mrf.mxu2  ;;  %v110_v31 = vrot.slane %v109_v37, 2  ;;  %v139_v36 = vadd.f32 %v138_v4, %v1956_v2  ;;  %v1258_v2 = vld [vmem:[%s2514_s11] sm:$0xff] }
 0x380   :  { %v887_v45 = vadd.f32 %v886_v43, %v2220_v63  ;;  %v976_v0 = vrot.slane %v975_v52, 2  ;;  %v1291_v43 = vld [vmem:[%s2513_s12 + $0xf8] sm:$0xff] }
 0x381   :  { %1358 = vmatpush.msra.mxu2 %v1291_v43 }
 0x382   :  { %v905_v54 = vmul.f32 %v887_v45, %v782_v6  ;;  %v977_v21 = vadd.f32 %v976_v0, %v975_v52  ;;  %v1289_v45 = vld [vmem:[%s2513_s12 + $0xe8] sm:$0xff]  ;;  %v1287_v52 = vld [vmem:[%s2513_s12 + $0xd8] sm:$0xff] }
 0x383   :  { %v1273_v6 = vld [vmem:[%s2513_s12 + $0x68] sm:$0xff]  ;;  %1359 = vmatpush.msra.mxu2 %v1290_v15  ;;  %v1283_v0 = vld [vmem:[%s2513_s12 + $0xb8] sm:$0xff] }
 0x384   :  { %v986_v59 = vrot.slane %v905_v54, 4  ;;  %v978_v60 = vrot.slane %v977_v21, 1  ;;  %1340 = vmatpush.msra.mxu0 %v1273_v6 }
 0x385   :  { %1360 = vmatpush.msra.mxu2 %v1289_v45 }
 0x386   :  { %v987_v10 = vadd.f32 %v986_v59, %v905_v54  ;;  %v979_v33 = vadd.f32 %v978_v60, %v977_v21  ;;  %v1271_v54 = vld [vmem:[%s2513_s12 + $0x58] sm:$0xff]  ;;  %1341 = vmatpush.msra.mxu0 %v1272_v50  ;;  %v1269_v59 = vld [vmem:[%s2513_s12 + $0x48] sm:$0xff]  ;;  %v114_v21 = vrot.slane %v1916_v5, 4  ;;  %v1278_v60 = vld [vmem:[%s2513_s12 + $0x90] sm:$0xff] }
 0x387   :  { %v889_v13 = vpop.f32.mrf.mxu2  ;;  %1361 = vmatpush.msra.mxu2 %v1288_v49 }
 0x388   :  { %v988_v3 = vrot.slane %v987_v10, 2  ;;  %v890_v18 = vadd.f32 %v889_v13, %v2220_v63  ;;  %v967_v63 = vadd.f32 %v966_v27, %v965_v19  ;;  %1342 = vmatpush.msra.mxu0 %v1271_v54  ;;  %v1281_v13 = vld [vmem:[%s2513_s12 + $0xa8] sm:$0xff]  ;;  %v102_v19 = vrot.slane %v1895_v20, 4  ;;  %v1263_v27 = vld [vmem:[%s2513_s12 + $0x18] sm:$0xff]  ;;  %v1257_v54 = vld [vmem:[%s2516_s0] sm:$0xff] }
 0x389   :  { %1362 = vmatpush.msra.mxu2 %v1287_v52  ;;  %v1068_v52 = vld [vmem:[%s2515_s10] sm:$0x3] }
 0x38a   :  { %v907_v22 = vmul.f32 %v890_v18, %v785_v40  ;;  %v989_v46 = vadd.f32 %v988_v3, %v987_v10  ;;  %v1107_v58 = vsel %vm1096_vm1, %v967_v63, %v1106_v30  ;;  %1343 = vmatpush.msra.mxu0 %v1270_v47  ;;  %v1267_v10 = vld [vmem:[%s2513_s12 + $0x38] sm:$0xff]  ;;  %v1265_v3 = vld [vmem:[%s2513_s12 + $0x28] sm:$0xff]  ;;  %v1264_v40 = vld [vmem:[%s2513_s12 + $0x20] sm:$0xff]  ;;  %v103_v25 = vadd.f32 %v102_v19, %v1895_v20 }
 0x38b   :  { %v1108_v51 = vsel %vm1098_vm11, %v979_v33, %v1107_v58  ;;  %1363 = vmatpush.msra.mxu2 %v1286_v55  ;;  %v1279_v18 = vld [vmem:[%s2513_s12 + $0x98] sm:$0xff]  ;;  %v127_v20 = vadd.f32 %v126_v8, %v1938_v12  ;;  %v1277_v33 = vld [vmem:[%s2513_s12 + $0x88] sm:$0xff]  ;;  %v111_v30 = vadd.f32 %v110_v31, %v109_v37 }
 0x38c   :  { %v998_v26 = vrot.slane %v907_v22, 4  ;;  %v990_v23 = vrot.slane %v989_v46, 1  ;;  %1344 = vmatpush.msra.mxu0 %v1269_v59  ;;  %v104_v48 = vrot.slane %v103_v25, 2 }
 0x38d   :  { %1364 = vmatpush.msra.mxu2 %v1285_v56  ;;  %v128_v63 = vrot.slane %v127_v20, 2  ;;  %v112_v16 = vrot.slane %v111_v30, 1 }
 0x38e   :  { %v999_v29 = vadd.f32 %v998_v26, %v907_v22  ;;  %v991_v38 = vadd.f32 %v990_v23, %v989_v46  ;;  %1345 = vmatpush.msra.mxu0 %v1268_v24  ;;  %v120_v22 = vrot.slane %v1927_v1, 4  ;;  %v132_v46 = vrot.slane %v1947_v34, 4 }
 0x38f   :  { %1365 = vmatpush.msra.mxu2 %v1284_v61  ;;  %v115_v26 = vadd.f32 %v114_v21, %v1916_v5  ;;  %v1261_v5 = vld [vmem:[%s2513_s12 + $0x8] sm:$0xff]  ;;  %v144_v23 = vrot.slane %v1990_v7, 4  ;;  %v113_v47 = vadd.f32 %v112_v16, %v111_v30 }
 0x390   :  { %v1000_v32 = vrot.slane %v999_v29, 2  ;;  %v1109_v41 = vsel %vm1100_vm12, %v991_v38, %v1108_v51  ;;  %1346 = vmatpush.msra.mxu0 %v1267_v10  ;;  %v133_v11 = vadd.f32 %v132_v46, %v1947_v34  ;;  %v1259_v34 = vld [vmem:[%s2514_s11 + $0x8] sm:$0xf]  ;;  %v129_v51 = vadd.f32 %v128_v63, %v127_v20 }
 0x391   :  { %1366 = vmatpush.msra.mxu2 %v1283_v0  ;;  %v145_v39 = vadd.f32 %v144_v23, %v1990_v7  ;;  %1502 = vmatpush.msk.msrb.mxu3 %vm1382_vm14, %v1259_v34  ;;  %v1070_v10 = vperm.slane %v1068_v52, 0 }
 0x392   :  { %v1001_v57 = vadd.f32 %v1000_v32, %v999_v29  ;;  %1347 = vmatpush.msra.mxu0 %v1266_v14  ;;  %v121_v29 = vadd.f32 %v120_v22, %v1927_v1  ;;  %v116_v32 = vrot.slane %v115_v26, 2  ;;  %v1260_v1 = vld [vmem:[%s2513_s12] sm:$0xff]  ;;  %v134_v38 = vrot.slane %v133_v11, 2 }
 0x393   :  { %1367 = vmatpush.msra.mxu2 %v1282_v62  ;;  %1401 = vmatpush.msrb.mxu3 %v1258_v2  ;;  %v146_v43 = vrot.slane %v145_v39, 2  ;;  %v130_v45 = vrot.slane %v129_v51, 1 }
 0x394   :  { %v1002_v53 = vrot.slane %v1001_v57, 1  ;;  %1348 = vmatpush.msra.mxu0 %v1265_v3  ;;  %v122_v12 = vrot.slane %v121_v29, 2  ;;  %v117_v58 = vadd.f32 %v116_v32, %v115_v26  ;;  %1503 = vmatmul.msk.f32.vlgmr.msrb.gmra.mxu3 %vm1378_vm15, %v1257_v54 }
 0x395   :  { %1368 = vmatpush.msra.mxu2 %v1281_v13  ;;  %v147_v50 = vadd.f32 %v146_v43, %v145_v39  ;;  %v131_v24 = vadd.f32 %v130_v45, %v129_v51 }
 0x396   :  { %v1003_v9 = vadd.f32 %v1002_v53, %v1001_v57  ;;  %1349 = vmatpush.msra.mxu0 %v1264_v40  ;;  %v1276_v57 = vld [vmem:[%s2513_s12 + $0x80] sm:$0xff]  ;;  %v105_v53 = vadd.f32 %v104_v48, %v103_v25  ;;  %v118_v7 = vrot.slane %v117_v58, 1 }
 0x397   :  { %1369 = vmatpush.msra.mxu2 %v1280_v35  ;;  %v148_v13 = vrot.slane %v147_v50, 1  ;;  %v151_v35 = vand.u32 2147483647, %v113_v47  ;;  %v154_v40 = vand.u32 2147483647, %v131_v24  ;;  %v1416_v48 = vld [vmem:[%s2519_s14 + $0x20] sm:$0xff] }
 0x398   :  { %v1110_v42 = vsel %vm1102_vm13, %v1003_v9, %v1109_v41  ;;  %1350 = vmatpush.msra.mxu0 %v1263_v27  ;;  %v123_v9 = vadd.f32 %v122_v12, %v121_v29  ;;  %v140_v41 = vrot.slane %v139_v36, 2  ;;  %v106_v15 = vrot.slane %v105_v53, 1 }
 0x399   :  { %1149 = vmatmul.f32.vlgmr.msrb.gmra.mxu1 %v1110_v42  ;;  %1370 = vmatpush.msra.mxu2 %v1279_v18  ;;  %v119_v56 = vadd.f32 %v118_v7, %v117_v58  ;;  %v149_v22 = vadd.f32 %v148_v13, %v147_v50  ;;  %vm2395_vm3 = vcmp.ne.f32.partialorder %v151_v35, 0.0  ;;  %vm2407_vm6 = vcmp.ne.f32.partialorder %v154_v40, 0.0 }
 0x39a   :  { %1351 = vmatpush.msra.mxu0 %v1262_v28  ;;  %v124_v44 = vrot.slane %v123_v9, 1  ;;  %v141_v6 = vadd.f32 %v140_v41, %v139_v36  ;;  %v107_v55 = vadd.f32 %v106_v15, %v105_v53  ;;  %v1071_v29 = vperm.slane %v1068_v52, 1 }
 0x39b   :  { %1371 = vmatpush.msra.mxu2 %v1278_v60  ;;  %v152_v3 = vand.u32 2147483647, %v119_v56  ;;  %v157_v31 = vand.u32 2147483647, %v149_v22 }
 0x39c   :  { %1352 = vmatpush.msra.mxu0 %v1261_v5  ;;  %v125_v61 = vadd.f32 %v124_v44, %v123_v9  ;;  %v142_v0 = vrot.slane %v141_v6, 1  ;;  %v150_v14 = vand.u32 2147483647, %v107_v55 }
 0x39d   :  { %1372 = vmatpush.msra.mxu2 %v1277_v33  ;;  %vm2399_vm4 = vcmp.ne.f32.partialorder %v152_v3, 0.0  ;;  %vm2433_vm15 = vcmp.ne.f32.partialorder %v157_v31, 0.0  ;;  %v1415_v31 = vld [vmem:[%s2519_s14 + $0x18] sm:$0xff] }
 0x39e   :  { %1353 = vmatpush.msra.mxu0 %v1260_v1  ;;  %v153_v18 = vand.u32 2147483647, %v125_v61  ;;  %v143_v19 = vadd.f32 %v142_v0, %v141_v6  ;;  %vm2391_vm0 = vcmp.ne.f32.partialorder %v150_v14, 0.0 }
 0x39f   :  { %1373 = vmatpush.msra.mxu2 %v1276_v57 }
 0x3a0   :  { %vm2403_vm5 = vcmp.ne.f32.partialorder %v153_v18, 0.0  ;;  %v156_v60 = vand.u32 2147483647, %v143_v19 }
 0x3a1   :  { %1189 = vmatmul.f32.vlgmr.msra.gmra.mxu1 %v1110_v42  ;;  %v135_v42 = vadd.f32 %v134_v38, %v133_v11 }
 0x3a2   :  { %vm2421_vm14 = vcmp.ne.f32.partialorder %v156_v60, 0.0 }
 0x3a3   :  { %v136_v49 = vrot.slane %v135_v42, 1 }
 0x3a5   :  { %v137_v62 = vadd.f32 %v136_v49, %v135_v42 }
 0x3a7   :  { %v155_v21 = vand.u32 2147483647, %v137_v62 }
 0x3a9   :  { %vm2411_vm7 = vcmp.ne.f32.partialorder %v155_v21, 0.0 }
 0x3da   :  { %v1130_v59 = vpop.f32.mrf.mxu3 }
 0x3db   :  { %v1131_v17 = vadd.f32 %v1130_v59, %v1070_v10 }
 0x3e2   :  { %v1170_v20 = vpop.f32.mrf.mxu3 }
 0x3e3   :  { %v1171_v57 = vadd.f32 %v1170_v20, %v1071_v29 }
 0x416   :  { %v1150_v8 = vpop.f32.mrf.mxu1 }
 0x417   :  { %v1151_v26 = vadd.f32 %v1150_v8, %v1131_v17 }
 0x419   :  { %v1211_v4 = vrot.slane %v1151_v26, 1  ;;  %v1213_v5 = vrot.slane %v1151_v26, 2  ;;  %v1215_v11 = vrot.slane %v1151_v26, 3  ;;  %v1217_v23 = vrot.slane %v1151_v26, 4 }
 0x41a   :  { %v1219_v32 = vrot.slane %v1151_v26, 5  ;;  %v1221_v1 = vrot.slane %v1151_v26, 6  ;;  %v1223_v12 = vrot.slane %v1151_v26, 7  ;;  %v1241_v2 = vsel %vm2391_vm0, %v1151_v26, 0.0 }
 0x41b   :  { %v1243_v63 = vsel %vm2395_vm3, %v1211_v4, 0.0  ;;  %v1245_v36 = vsel %vm2399_vm4, %v1213_v5, 0.0  ;;  %v1247_v33 = vsel %vm2403_vm5, %v1215_v11, 0.0  ;;  %v1249_v38 = vsel %vm2407_vm6, %v1217_v23, 0.0  ;;  %v1419_v5 = vld [vmem:[%s2519_s14 + $0x38] sm:$0xff]  ;;  %v1418_v11 = vld [vmem:[%s2519_s14 + $0x30] sm:$0xff] }
 0x41c   :  { %v1308_v39 = vrot.slane %v1243_v63, 7  ;;  %v1251_v53 = vsel %vm2411_vm7, %v1219_v32, 0.0  ;;  %v1253_v30 = vsel %vm2421_vm14, %v1221_v1, 0.0  ;;  %v1310_v58 = vrot.slane %v1245_v36, 6  ;;  %1435 = vmatpush.msra.mxu3 %v1419_v5  ;;  %v1417_v23 = vld [vmem:[%s2519_s14 + $0x28] sm:$0xff]  ;;  %v1414_v32 = vld [vmem:[%s2519_s14 + $0x10] sm:$0xff]  ;;  %v1403_v63 = vpop.f32.mrf.mxu3 }
 0x41d   :  { %v1312_v42 = vrot.slane %v1247_v33, 5  ;;  %v1255_v15 = vsel %vm2433_vm15, %v1223_v12, 0.0  ;;  %v1314_v7 = vrot.slane %v1249_v38, 4  ;;  %v1316_v45 = vrot.slane %v1251_v53, 3  ;;  %v1413_v1 = vld [vmem:[%s2519_s14 + $0x8] sm:$0xff]  ;;  %v1412_v12 = vld [vmem:[%s2519_s14] sm:$0xff] }
 0x41e   :  { %v1190_v51 = vpop.f32.mrf.mxu1  ;;  %v1309_v41 = vsel %vm1090_vm8, %v1308_v39, %v1241_v2  ;;  %v1318_v6 = vrot.slane %v1253_v30, 2  ;;  %v1320_v47 = vrot.slane %v1255_v15, 1  ;;  %1436 = vmatpush.msra.mxu3 %v1418_v11  ;;  %v1509_v53 = vld [vmem:[%s2518_s15] ss:$0 sm:$0xff] }
 0x41f   :  { %v1191_v43 = vadd.f32 %v1190_v51, %v1171_v57  ;;  %v1311_v16 = vsel %vm1092_vm9, %v1310_v58, %v1309_v41  ;;  %v1508_v57 = vld [vmem:[%s2517_s13] ss:$0 sm:$0xff] }
 0x420   :  { %v1313_v44 = vsel %vm1094_vm10, %v1312_v42, %v1311_v16  ;;  %1437 = vmatpush.msra.mxu3 %v1417_v23 }
 0x421   :  { %v1315_v49 = vsel %vm1096_vm1, %v1314_v7, %v1313_v44  ;;  %v1212_v50 = vrot.slane %v1191_v43, 1  ;;  %v1214_v52 = vrot.slane %v1191_v43, 2  ;;  %v1216_v54 = vrot.slane %v1191_v43, 3 }
 0x422   :  { %v1317_v55 = vsel %vm1098_vm11, %v1316_v45, %v1315_v49  ;;  %v1218_v56 = vrot.slane %v1191_v43, 4  ;;  %v1220_v59 = vrot.slane %v1191_v43, 5  ;;  %v1222_v24 = vrot.slane %v1191_v43, 6  ;;  %1438 = vmatpush.msra.mxu3 %v1416_v48 }
 0x423   :  { %v1319_v61 = vsel %vm1100_vm12, %v1318_v6, %v1317_v55  ;;  %v1244_v0 = vsel %vm2395_vm3, %v1212_v50, 0.0  ;;  %v1224_v62 = vrot.slane %v1191_v43, 7  ;;  %v1246_v13 = vsel %vm2399_vm4, %v1214_v52, 0.0 }
 0x424   :  { %v1321_v10 = vsel %vm1102_vm13, %v1320_v47, %v1319_v61  ;;  %v1248_v14 = vsel %vm2403_vm5, %v1216_v54, 0.0  ;;  %v1250_v35 = vsel %vm2407_vm6, %v1218_v56, 0.0  ;;  %v1322_v3 = vrot.slane %v1244_v0, 7  ;;  %1439 = vmatpush.msra.mxu3 %v1415_v31 }
 0x425   :  { %1354 = vmatmul.f32.vlgmr.msra.gmra.mxu0 %v1321_v10  ;;  %v1242_v18 = vsel %vm2391_vm0, %v1191_v43, 0.0  ;;  %v1252_v40 = vsel %vm2411_vm7, %v1220_v59, 0.0  ;;  %v1324_v19 = vrot.slane %v1246_v13, 6  ;;  %v1254_v17 = vsel %vm2421_vm14, %v1222_v24, 0.0 }
 0x426   :  { %v1323_v21 = vsel %vm1090_vm8, %v1322_v3, %v1242_v18  ;;  %v1326_v22 = vrot.slane %v1248_v14, 5  ;;  %v1256_v8 = vsel %vm2433_vm15, %v1224_v62, 0.0  ;;  %v1328_v37 = vrot.slane %v1250_v35, 4  ;;  %1440 = vmatpush.msra.mxu3 %v1414_v32 }
 0x427   :  { %v1325_v25 = vsel %vm1092_vm9, %v1324_v19, %v1323_v21  ;;  %v1330_v46 = vrot.slane %v1252_v40, 3  ;;  %v1332_v28 = vrot.slane %v1254_v17, 2  ;;  %v1334_v29 = vrot.slane %v1256_v8, 1 }
 0x428   :  { %v1327_v26 = vsel %vm1094_vm10, %v1326_v22, %v1325_v25  ;;  %1441 = vmatpush.msra.mxu3 %v1413_v1 }
 0x429   :  { %v1329_v27 = vsel %vm1096_vm1, %v1328_v37, %v1327_v26 }
 0x42a   :  { %v1331_v60 = vsel %vm1098_vm11, %v1330_v46, %v1329_v27  ;;  %1442 = vmatpush.msra.mxu3 %v1412_v12 }
 0x42b   :  { %v1333_v20 = vsel %vm1100_vm12, %v1332_v28, %v1331_v60 }
 0x42c   :  { %v1335_v4 = vsel %vm1102_vm13, %v1334_v29, %v1333_v20 }
 0x42d   :  { %1374 = vmatmul.f32.vlgmr.msra.gmra.mxu2 %v1335_v4 }
 0x4a2   :  { %v1355_v36 = vpop.f32.mrf.mxu0 }
 0x4b0   :  { %v1375_v33 = vpop.f32.mrf.mxu2 }
 0x4b1   :  { %v1376_v34 = vadd.f32 %v1375_v33, %v1355_v36 }
 0x4b3   :  { %v1404_v38 = vadd.f32 %v1403_v63, %v1376_v34 }
 0x4b5   :  { %v1410_v39 = vadd.f32 %v1508_v57, %v1404_v38 }
 0x4b7   :  { %1560 = vtanh.f32 %v1410_v39 }
 0x4bd   :  { %v1561_v2 = vpop.eup %1560 }
 0x4be   :  { %1504 = vmatmul.msk.f32.vlgmr.msra.gmra.mxu3 %vm240_vm2, %v1561_v2 }
 0x541   :  { %v1444_v30 = vpop.f32.mrf.mxu3 }
 0x542   :  { %v1445_v58 = vadd.f32 %v1509_v53, %v1444_v30 }
 0x544   :  { %1562 = vtanh.f32 %v1445_v58 }
 0x54a   :  { %v1563_v9 = vpop.eup %1562 }
 0x54b   :  { %1448 = vst.msk [vmem:[%s2520_s16] sm:$0xff] %vm240_vm2, %v1563_v9 }

</bundles_post_ra>
